<compile_context>
chip_gen: v7x
topology: tpu7x:2x2x1
jax: 0.10.0
libtpu: 0.0.40
codegen_flags: <defaults>
</compile_context>

<pallas_src>
import jax
import jax.numpy as jnp
from jax import lax
from jax.experimental import pallas as pl
from jax.experimental.pallas import tpu as pltpu


# ---------------------------------------------------------------------------
# Kernel
# ---------------------------------------------------------------------------
def _make_attention_kernel(S, tb, E2, Ddec, s_chunk, lane_dense):
    n_chunks = S // s_chunk

    def kernel(hid_ref, enc_ref, wh_ref, we_ref, b_ref, v_ref, out_ref, scores_ref):
        # hidden projection + bias, once per grid step (MXU, f32 accumulate)
        hb = jnp.dot(hid_ref[...], wh_ref[...],
                     preferred_element_type=jnp.float32) + b_ref[...]      # (tb, Ddec)
        v_row = v_ref[...]                                                 # (1, Ddec) f32

        def compute_chunk(start):
            enc_c = enc_ref[pl.ds(start, s_chunk)]                         # (s_chunk, tb, E2)
            # one flat MXU matmul per chunk: (s_chunk*tb, 2E) @ (2E, Ddec)
            e_proj = jnp.dot(enc_c.reshape(s_chunk * tb, E2), we_ref[...],
                             preferred_element_type=jnp.float32)
            energy = jnp.tanh(e_proj.reshape(s_chunk, tb, Ddec) + hb[None, :, :])
            # scores = energy . v  -> VPU multiply + XLU lane reduce (no N=1 matmul)
            scores_ref[pl.ds(start, s_chunk), :] = jnp.sum(
                energy * v_row[None, :, :], axis=-1)                       # (s_chunk, tb)

        if n_chunks <= 8:
            for c in range(n_chunks):                   # static slices: free
                compute_chunk(c * s_chunk)
        else:
            def body(c, carry):
                compute_chunk(pl.multiple_of(c * s_chunk, s_chunk))
                return carry
            lax.fori_loop(0, n_chunks, body, 0)

        # softmax over src_len (axis 0) with batch sitting on the lane axis
        scores = scores_ref[...]                                           # (S, tb)
        m = jnp.max(scores, axis=0, keepdims=True)                         # (1, tb)
        ex = jnp.exp(scores - m)                                           # (S, tb)
        denom = jnp.sum(ex, axis=0, keepdims=True)                         # (1, tb)
        inv = pl.reciprocal(denom, approx=True)                            # EUP slot
        inv = inv * (2.0 - denom * inv)                                    # one Newton step
        probs = ex * inv                                                   # (S, tb)

        if lane_dense:
            out_ref[...] = probs        # (S, tb): no transpose, no narrow masked stores
        else:
            out_ref[...] = probs.T      # (tb, S): S >= 128, already lane-dense

    return kernel


# ---------------------------------------------------------------------------
# Tiling / footprint heuristics
# ---------------------------------------------------------------------------
_VMEM_BUDGET = 20 * 1024 * 1024   # conservative per-step budget: fits v7x's 64 MiB VMEM


def _choose_s_chunk(S, tb):
    # Aim M = s_chunk * tb <= 1024 (amortize MXU fill/drain while capping the
    # live (chunk, tb, Ddec) intermediate); must divide S.
    hi = max(1, 1024 // tb)
    best = 1
    for c in range(1, min(S, hi) + 1):
        if S % c == 0:
            best = c
    return best


def _step_vmem_bytes(S, tb, E2, Ddec, mxu_itemsize, s_chunk):
    enc_blk = S * tb * E2 * mxu_itemsize
    hid_blk = tb * Ddec * mxu_itemsize
    out_blk = S * tb * 4
    weights = (Ddec + E2) * Ddec * mxu_itemsize + 2 * Ddec * 4
    scores = S * tb * 4
    energy_live = 2 * s_chunk * tb * Ddec * 4     # e_proj + energy per chunk
    # inputs / outputs / weights double-buffered by the BlockSpec pipeline
    return 2 * (enc_blk + hid_blk + out_blk + weights) + scores + energy_live


def _choose_tb(S, B, E2, Ddec, mxu_itemsize):
    cands = sorted({tb for tb in range(8, B + 1, 8) if B % tb == 0}, reverse=True)
    assert cands, "batch must be padded to a multiple of 8"

    def fits(tb):
        return _step_vmem_bytes(S, tb, E2, Ddec, mxu_itemsize,
                                _choose_s_chunk(S, tb)) <= _VMEM_BUDGET

    # Tiny problem: one fat step (nothing worth pipelining; extra steps are overhead).
    if S * B * E2 * mxu_itemsize <= (1 << 20) and fits(B):
        return B
    # Otherwise >= 4 grid steps (pipeline depth on 1-TC chips, >= 2 iters per v7x TC),
    # enc DMA stride >= 16 KiB, per-step footprint inside the VMEM budget.
    for tb in cands:
        if B // tb >= 4 and tb * E2 * mxu_itemsize >= 16 * 1024 and fits(tb):
            return tb
    for tb in cands:                          # relax the DMA-stride constraint
        if B // tb >= 4 and fits(tb):
            return tb
    for tb in cands:                          # small B: 1 or 3+ steps, never exactly 2
        if B // tb != 2 and fits(tb):
            return tb
    return cands[-1]                          # smallest tile as a last resort


# ---------------------------------------------------------------------------
# Wrapper
# ---------------------------------------------------------------------------
def attention_forward(hidden, encoder_outputs, w_attn, b_attn, w_v, *,
                      mxu_dtype=jnp.float32):
    """Bahdanau attention forward.

    hidden:          (B, Ddec)      float32
    encoder_outputs: (S, B, 2*E)    float32 (PyTorch seq-first layout, no transpose)
    w_attn:          (Ddec, Ddec+2E) attn_fc weight (PyTorch (out, in) layout)
    b_attn:          (Ddec,)         attn_fc bias
    w_v:             (1, Ddec)       v_fc weight (no bias)
    mxu_dtype:       dtype fed to the MXU (bf16 halves enc HBM traffic on v6e/v7x;
                     accumulation and the tanh/softmax path stay f32)
    returns:         (B, S) float32, softmax over src_len.
    """
    S, B, E2 = encoder_outputs.shape
    Ddec = hidden.shape[1]

    # Split the concat-Linear:  y = cat(h, enc) @ W.T + b  ==  h @ W_h + enc @ W_e + b
    w_attn_t = jnp.asarray(w_attn).T                          # (Ddec + 2E, Ddec)
    W_h = w_attn_t[:Ddec, :].astype(mxu_dtype)                # (Ddec, Ddec)
    W_e = w_attn_t[Ddec:, :].astype(mxu_dtype)                # (2E,  Ddec)
    b = b_attn.reshape(1, Ddec).astype(jnp.float32)
    v = w_v.reshape(1, Ddec).astype(jnp.float32)

    hid = hidden.astype(mxu_dtype)
    enc = encoder_outputs.astype(mxu_dtype)

    # Pad batch to a multiple of 8 (sublane rule); padded rows are dropped at the end.
    Bp = ((B + 7) // 8) * 8
    if Bp != B:
        hid = jnp.pad(hid, ((0, Bp - B), (0, 0)))
        enc = jnp.pad(enc, ((0, 0), (0, Bp - B), (0, 0)))

    mxu_itemsize = jnp.dtype(mxu_dtype).itemsize
    tb = _choose_tb(S, Bp, E2, Ddec, mxu_itemsize)
    s_chunk = _choose_s_chunk(S, tb)
    n_steps = Bp // tb
    lane_dense = S < 128

    footprint = _step_vmem_bytes(S, tb, E2, Ddec, mxu_itemsize, s_chunk)
    vmem_limit = int(min(64 * 2**20, max(32 * 2**20, 2 * footprint)))

    kernel = _make_attention_kernel(S, tb, E2, Ddec, s_chunk, lane_dense)

    in_specs = [
        pl.BlockSpec((tb, Ddec), lambda i: (i, 0)),
        pl.BlockSpec((S, tb, E2), lambda i: (0, i, 0)),   # seq-first, no wrapper transpose
        pl.BlockSpec((Ddec, Ddec), lambda i: (0, 0)),
        pl.BlockSpec((E2, Ddec), lambda i: (0, 0)),
        pl.BlockSpec((1, Ddec), lambda i: (0, 0)),
        pl.BlockSpec((1, Ddec), lambda i: (0, 0)),
    ]
    if lane_dense:
        out_shape = jax.ShapeDtypeStruct((n_steps, S, tb), jnp.float32)
        out_specs = pl.BlockSpec((None, S, tb), lambda i: (i, 0, 0))
    else:
        out_shape = jax.ShapeDtypeStruct((Bp, S), jnp.float32)
        out_specs = pl.BlockSpec((tb, S), lambda i: (i, 0))

    out = pl.pallas_call(
        kernel,
        out_shape=out_shape,
        grid_spec=pltpu.PrefetchScalarGridSpec(
            num_scalar_prefetch=0,
            grid=(n_steps,),
            in_specs=in_specs,
            out_specs=out_specs,
            scratch_shapes=[pltpu.VMEM((S, tb), jnp.float32)],
        ),
        compiler_params=pltpu.CompilerParams(
            dimension_semantics=("parallel",),
            vmem_limit_bytes=vmem_limit),
    )(hid, enc, W_h, W_e, b, v)

    if lane_dense:
        # (n_steps, S, tb) -> (Bp, S): wrapper-side layout plumbing only.
        out = out.transpose(0, 2, 1).reshape(Bp, S)
    return out[:B]


def attention_ref(hidden, encoder_outputs, w_attn, b_attn, w_v):
    """Pure-JAX reference mirroring the PyTorch forward exactly."""
    S, B, _ = encoder_outputs.shape
    hid_rep = jnp.repeat(hidden[:, None, :], S, axis=1)          # (B, S, Ddec)
    enc_bf = jnp.transpose(encoder_outputs, (1, 0, 2))           # (B, S, 2E)
    cat = jnp.concatenate([hid_rep, enc_bf], axis=2)             # (B, S, Ddec+2E)
    energy = jnp.tanh(cat @ w_attn.T + b_attn)                   # (B, S, Ddec)
    scores = (energy @ w_v.T)[:, :, 0]                           # (B, S)
    return jax.nn.softmax(scores, axis=1)


if __name__ == "__main__":
    # module constants: encoder_hidden_dim = decoder_hidden_dim = 128
    enc_hid = 128
    dec_hid = 128
    batch = 64         # spec uses 512; kept small for the test
    src_len = 32

    key = jax.random.PRNGKey(0)
    k1, k2, k3, k4, k5 = jax.random.split(key, 5)

    hidden = jax.random.normal(k1, (batch, dec_hid), dtype=jnp.float32)
    encoder_outputs = jax.random.normal(k2, (src_len, batch, 2 * enc_hid),
                                        dtype=jnp.float32)

    in_dim = 2 * enc_hid + dec_hid
    bound_a = 1.0 / jnp.sqrt(in_dim)
    bound_v = 1.0 / jnp.sqrt(dec_hid)
    w_attn = jax.random.uniform(k3, (dec_hid, in_dim), minval=-bound_a,
                                maxval=bound_a, dtype=jnp.float32)
    b_attn = jax.random.uniform(k4, (dec_hid,), minval=-bound_a,
                                maxval=bound_a, dtype=jnp.float32)
    w_v = jax.random.uniform(k5, (1, dec_hid), minval=-bound_v,
                             maxval=bound_v, dtype=jnp.float32)

    ref = attention_ref(hidden, encoder_outputs, w_attn, b_attn, w_v)

    # f32 MXU path (multi-step parallel grid, lane-dense (S, tb) output)
    out = jax.block_until_ready(
        attention_forward(hidden, encoder_outputs, w_attn, b_attn, w_v))
    assert out.shape == (batch, src_len)
    assert jnp.allclose(out, ref, atol=1e-5, rtol=1e-5), "f32 mismatch vs reference"
    assert jnp.allclose(jnp.sum(out, axis=1), 1.0, atol=1e-5)

    # bf16 MXU path (halved enc HBM traffic; f32 accumulation + f32 softmax)
    out_bf16 = jax.block_until_ready(
        attention_forward(hidden, encoder_outputs, w_attn, b_attn, w_v,
                          mxu_dtype=jnp.bfloat16))
    assert out_bf16.shape == (batch, src_len)
    assert jnp.allclose(out_bf16, ref, atol=5e-2, rtol=5e-2), "bf16 mismatch vs reference"
    assert jnp.allclose(jnp.sum(out_bf16, axis=1), 1.0, atol=1e-3)

    # S >= 128 path: kernel writes the (batch, src_len) layout directly
    src_len2, batch2 = 128, 16
    h2 = jax.random.normal(k1, (batch2, dec_hid), dtype=jnp.float32)
    e2 = jax.random.normal(k2, (src_len2, batch2, 2 * enc_hid), dtype=jnp.float32)
    out2 = jax.block_until_ready(attention_forward(h2, e2, w_attn, b_attn, w_v))
    ref2 = attention_ref(h2, e2, w_attn, b_attn, w_v)
    assert jnp.allclose(out2, ref2, atol=1e-5, rtol=1e-5), "S>=128 mismatch vs reference"

    print("KERNEL_OK")
</pallas_src>

<mosaic_0001>
module attributes {stable_mosaic.version = 11 : i64} {
  func.func @kernel(%arg0: i32, %arg1: memref<16x128xf32, #tpu.memory_space<vmem>>, %arg2: memref<32x16x256xf32, #tpu.memory_space<vmem>>, %arg3: memref<128x128xf32, #tpu.memory_space<vmem>>, %arg4: memref<256x128xf32, #tpu.memory_space<vmem>>, %arg5: memref<1x128xf32, #tpu.memory_space<vmem>>, %arg6: memref<1x128xf32, #tpu.memory_space<vmem>>, %arg7: memref<1x32x16xf32, #tpu.memory_space<vmem>>, %arg8: memref<32x16xf32, #tpu.memory_space<vmem>>) attributes {dimension_semantics = [#tpu.dimension_semantics<parallel>], iteration_bounds = array<i64: 4>, scalar_prefetch = 0 : i64, scratch_operands = 1 : i64, tpu.core_type = #tpu.core_type<tc>, window_params = [{transform_indices = @transform_0, window_bounds = array<i64: 16, 128>}, {transform_indices = @transform_1, window_bounds = array<i64: 32, 16, 256>}, {pipeline_mode = #tpu.pipeline_mode<synchronous>, transform_indices = @transform_2, window_bounds = array<i64: 128, 128>}, {pipeline_mode = #tpu.pipeline_mode<synchronous>, transform_indices = @transform_3, window_bounds = array<i64: 256, 128>}, {pipeline_mode = #tpu.pipeline_mode<synchronous>, transform_indices = @transform_4, window_bounds = array<i64: 1, 128>}, {pipeline_mode = #tpu.pipeline_mode<synchronous>, transform_indices = @transform_5, window_bounds = array<i64: 1, 128>}, {transform_indices = @transform_6, window_bounds = array<i64: 1, 32, 16>}]} {
    %c0 = arith.constant 0 : index
    %c0_0 = arith.constant 0 : index
    %0 = vector.load %arg1[%c0, %c0_0] : memref<16x128xf32, #tpu.memory_space<vmem>>, vector<16x128xf32>
    %c0_1 = arith.constant 0 : index
    %c0_2 = arith.constant 0 : index
    %1 = vector.load %arg3[%c0_1, %c0_2] : memref<128x128xf32, #tpu.memory_space<vmem>>, vector<128x128xf32>
    %cst = arith.constant dense<0.000000e+00> : vector<16x128xf32>
    %2 = tpu.matmul %0, %1, %cst {dimension_numbers = #tpu.dot_dimension_numbers<[1], [0], [0], [1], [0, 0, 1, 1], [], []>} : vector<16x128xf32>, vector<128x128xf32>, vector<16x128xf32> -> vector<16x128xf32>
    %c0_3 = arith.constant 0 : index
    %c0_4 = arith.constant 0 : index
    %3 = vector.load %arg5[%c0_3, %c0_4] : memref<1x128xf32, #tpu.memory_space<vmem>>, vector<1x128xf32>
    %4 = vector.broadcast %3 : vector<1x128xf32> to vector<16x128xf32>
    %5 = arith.addf %2, %4 : vector<16x128xf32>
    %c0_5 = arith.constant 0 : index
    %c0_6 = arith.constant 0 : index
    %6 = vector.load %arg6[%c0_5, %c0_6] : memref<1x128xf32, #tpu.memory_space<vmem>>, vector<1x128xf32>
    %c0_7 = arith.constant 0 : index
    %c0_8 = arith.constant 0 : index
    %c0_9 = arith.constant 0 : index
    %7 = vector.load %arg2[%c0_7, %c0_8, %c0_9] : memref<32x16x256xf32, #tpu.memory_space<vmem>>, vector<32x16x256xf32>
    %8 = vector.shape_cast %7 : vector<32x16x256xf32> to vector<512x256xf32>
    %c0_10 = arith.constant 0 : index
    %c0_11 = arith.constant 0 : index
    %9 = vector.load %arg4[%c0_10, %c0_11] : memref<256x128xf32, #tpu.memory_space<vmem>>, vector<256x128xf32>
    %cst_12 = arith.constant dense<0.000000e+00> : vector<512x128xf32>
    %10 = tpu.matmul %8, %9, %cst_12 {dimension_numbers = #tpu.dot_dimension_numbers<[1], [0], [0], [1], [0, 0, 1, 1], [], []>} : vector<512x256xf32>, vector<256x128xf32>, vector<512x128xf32> -> vector<512x128xf32>
    %11 = vector.shape_cast %10 : vector<512x128xf32> to vector<32x16x128xf32>
    %12 = vector.shape_cast %5 : vector<16x128xf32> to vector<1x16x128xf32>
    %13 = vector.broadcast %12 : vector<1x16x128xf32> to vector<32x16x128xf32>
    %14 = arith.addf %11, %13 : vector<32x16x128xf32>
    %15 = math.tanh %14 : vector<32x16x128xf32>
    %16 = vector.shape_cast %6 : vector<1x128xf32> to vector<1x1x128xf32>
    %17 = vector.broadcast %16 : vector<1x1x128xf32> to vector<32x16x128xf32>
    %18 = arith.mulf %15, %17 : vector<32x16x128xf32>
    %cst_13 = arith.constant dense<0.000000e+00> : vector<32x16xf32>
    %19 = vector.multi_reduction <add>, %18, %cst_13 [2] : vector<32x16x128xf32> to vector<32x16xf32>
    %c0_14 = arith.constant 0 : index
    %c0_15 = arith.constant 0 : index
    %20 = vector.load %arg8[%c0_14, %c0_15] : memref<32x16xf32, #tpu.memory_space<vmem>>, vector<32x16xf32>
    tpu.vector_store %arg8[%c0_14, %c0_15], %19 {strides = array<i32>} : memref<32x16xf32, #tpu.memory_space<vmem>>, vector<32x16xf32>,
    %c0_16 = arith.constant 0 : index
    %c0_17 = arith.constant 0 : index
    %21 = vector.load %arg8[%c0_16, %c0_17] : memref<32x16xf32, #tpu.memory_space<vmem>>, vector<32x16xf32>
    %cst_18 = arith.constant dense<0xFF800000> : vector<16xf32>
    %22 = vector.multi_reduction <maximumf>, %21, %cst_18 [0] : vector<32x16xf32> to vector<16xf32>
    %23 = vector.shape_cast %22 : vector<16xf32> to vector<1x16xf32>
    %24 = vector.broadcast %23 : vector<1x16xf32> to vector<32x16xf32>
    %25 = arith.subf %21, %24 : vector<32x16xf32>
    %26 = math.exp %25 : vector<32x16xf32>
    %cst_19 = arith.constant dense<0.000000e+00> : vector<16xf32>
    %27 = vector.multi_reduction <add>, %26, %cst_19 [0] : vector<32x16xf32> to vector<16xf32>
    %28 = vector.shape_cast %27 : vector<16xf32> to vector<1x16xf32>
    %29 = tpu.reciprocal %28 {approx = true} : vector<1x16xf32> -> vector<1x16xf32>
    %30 = arith.mulf %28, %29 : vector<1x16xf32>
    %cst_20 = arith.constant 2.000000e+00 : f32
    %31 = vector.broadcast %cst_20 : f32 to vector<1x16xf32>
    %32 = arith.subf %31, %30 : vector<1x16xf32>
    %33 = arith.mulf %29, %32 : vector<1x16xf32>
    %34 = vector.broadcast %33 : vector<1x16xf32> to vector<32x16xf32>
    %35 = arith.mulf %26, %34 : vector<32x16xf32>
    %c0_21 = arith.constant 0 : index
    %c0_22 = arith.constant 0 : index
    %c0_23 = arith.constant 0 : index
    %36 = vector.load %arg7[%c0_21, %c0_22, %c0_23] : memref<1x32x16xf32, #tpu.memory_space<vmem>>, vector<1x32x16xf32>
    %37 = vector.shape_cast %36 : vector<1x32x16xf32> to vector<32x16xf32>
    %38 = vector.shape_cast %35 : vector<32x16xf32> to vector<1x32x16xf32>
    tpu.vector_store %arg7[%c0_21, %c0_22, %c0_23], %38 {strides = array<i32>} : memref<1x32x16xf32, #tpu.memory_space<vmem>>, vector<1x32x16xf32>,
    return
  }
  func.func @transform_0(%arg0: i32) -> (i32, i32) {
    %c0_i32 = arith.constant 0 : i32
    %c0_i32_0 = arith.constant 0 : i32
    return %arg0, %c0_i32 : i32, i32
  }
  func.func @transform_1(%arg0: i32) -> (i32, i32, i32) {
    %c0_i32 = arith.constant 0 : i32
    %c0_i32_0 = arith.constant 0 : i32
    %c0_i32_1 = arith.constant 0 : i32
    return %c0_i32, %arg0, %c0_i32_0 : i32, i32, i32
  }
  func.func @transform_2(%arg0: i32) -> (i32, i32) {
    %c0_i32 = arith.constant 0 : i32
    %c0_i32_0 = arith.constant 0 : i32
    %c0_i32_1 = arith.constant 0 : i32
    return %c0_i32, %c0_i32_0 : i32, i32
  }
  func.func @transform_3(%arg0: i32) -> (i32, i32) {
    %c0_i32 = arith.constant 0 : i32
    %c0_i32_0 = arith.constant 0 : i32
    %c0_i32_1 = arith.constant 0 : i32
    return %c0_i32, %c0_i32_0 : i32, i32
  }
  func.func @transform_4(%arg0: i32) -> (i32, i32) {
    %c0_i32 = arith.constant 0 : i32
    %c0_i32_0 = arith.constant 0 : i32
    %c0_i32_1 = arith.constant 0 : i32
    return %c0_i32, %c0_i32_0 : i32, i32
  }
  func.func @transform_5(%arg0: i32) -> (i32, i32) {
    %c0_i32 = arith.constant 0 : i32
    %c0_i32_0 = arith.constant 0 : i32
    %c0_i32_1 = arith.constant 0 : i32
    return %c0_i32, %c0_i32_0 : i32, i32
  }
  func.func @transform_6(%arg0: i32) -> (i32, i32, i32) {
    %c0_i32 = arith.constant 0 : i32
    %c0_i32_0 = arith.constant 0 : i32
    %c0_i32_1 = arith.constant 0 : i32
    return %arg0, %c0_i32, %c0_i32_0 : i32, i32, i32
  }
}

</mosaic_0001>

<bundles_post_ra>
// kernel: tpu_custom_call.1
= control target key start
LH: loop header
LB: loop body
LE: loop exit
PB: predicated region body
PF: predicated region fallthrough
CT: control target
= control target key end

     0   :  { %11 = vsyncpa [#allocation4], 0  ;;  %s3395_s0 = inlined_call_operand.hbm [shape: f32[64,128], index: 0, kind: input, shape index: {}]   ;;  %s3396_s1 = inlined_call_operand.hbm [shape: f32[32,64,256], index: 1, kind: input, shape index: {}]   ;;  %s3397_s2 = inlined_call_operand.hbm [shape: f32[128,128], index: 2, kind: input, shape index: {}]   ;;  %s3398_s3 = inlined_call_operand.hbm [shape: f32[256,128], index: 3, kind: input, shape index: {}]   ;;  %s3399_s4 = inlined_call_operand.hbm [shape: f32[1,128], index: 4, kind: input, shape index: {}]   ;;  %s3400_s5 = inlined_call_operand.hbm [shape: f32[1,128], index: 5, kind: input, shape index: {}]   ;;  %s3401_s6 = inlined_call_operand.vmem [shape: f32[4,32,16], index: 6, kind: output, shape index: {}]  }
   0x1   :  { %13 = vsyncpa [#allocation4 + $0x1], 0 }
   0x2   :  { %14 = vsyncpa [#allocation6], 0 }
   0x3   :  { %16 = vsyncpa [#allocation6 + $0x1], 0 }
   0x4   :  { %17 = vsyncpa [#allocation9], 0 }
   0x5   :  { %18 = vsyncpa [#allocation12], 0  ;;  %s2622_s21 = smov 0   ;;  %s2624_s22 = smov 0  }
   0x6   :  { %s2626_s23 = smov 0   ;;  %s2628_s24 = smov 0  }
   0x7 LB: > { %s2641_s25 = sadd.s32 4294967295, %s2569_s24   ;;  %s2644_s26 = sadd.s32 1, %s2569_s24   ;;  %s2569_s24 = sphi %s2628_s24, %s3425_s24   ;;  %s2565_s23 = sphi %s2626_s23, %s3424_s23   ;;  %s2561_s22 = sphi %s2624_s22, %s3423_s22   ;;  %s2557_s21 = sphi %s2622_s21, %s3422_s21  }
   0x8   : > { %s28_s27 = ssub.s32 %s2569_s24, %s2644_s26  ;;  %s31_s28 = sadd.s32 1, %s2565_s23 }
   0x9   : > { %p29_p0 = scmp.eq.s32.totalorder %s28_s27, 0  ;;  %p38_p1 = scmp.ne.s32.totalorder %s2565_s23, %s2561_s22 }
   0xa   : > { %p39_p2 = scmp.eq.s32.totalorder %s2569_s24, 0  ;;  %p44_p3 = scmp.ne.s32.totalorder %s2561_s22, %s2557_s21 }
   0xb   : > { %s2654_s29 = scalar_select %p29_p0, %s2565_s23, %s31_s28  }
   0xc   : > { %p2656_p4 = por %p39_p2, %p38_p1  ;;  %p3402_p5 = scmp.eq.s32.totalorder %s2641_s25, 0 }
   0xd   : > { %3406 = sst [smem:[#allocation21_spill]] %s2654_s29  ;;  %p1949_p6 = scmp.ge.s32.totalorder %s2569_s24, 1 }
   0xe   : > { %s3407_s30 = scalar_select %p2656_p4, 1, 0 }
   0xf   : > { %p191_p7 = scmp.lt.s32.totalorder %s2569_s24, 5  ;;  %p2665_p8 = por %p3402_p5, %p44_p3 }
  0x10   : > { %s2571_s9 = smov [#allocation8]   ;;  %s2572_s12 = smov [#allocation7]  }
  0x11   : > { %s3408_s7 = scalar_select %p2665_p8, 1, 0 }
  0x12   : > { %p2669_p9 = pnand %p1949_p6, %p191_p7  ;;  %s216_s10 = sshll.u32 %s2571_s9, 4  ;;  %s2675_s10 = int_to_ptr.vmem [resolvable:$true] %s216_s10 }
  0x13   : > { %s203_s13 = sshll.u32 %s2572_s12, 4  ;;  %s2573_s14 = smov [#allocation10]   ;;  %s2683_s13 = int_to_ptr.vmem [resolvable:$true] %s203_s13 }
  0x14   : > { %s3409_s8 = scalar_select %p2669_p9, 1, 0 }
  0x15   : > { %p2173_p10 = pneg %p2669_p9  ;;  %s2685_s15 = sshll.u32 %s2573_s14, 4  ;;  %s231_s15 = int_to_ptr.vmem [resolvable:$true] %s2685_s15 }
  0x16   : > { %s2379_s18 = scalar_lea.hbm %s3398_s3, 4096 }
  0x17   : > { %p2679_p11 = pnand %p2173_p10, %p3402_p5  ;;  %p2380_p12 = scmp.ne.s32.totalorder %s3398_s3, %s2379_s18 }
  0x18   : > { %p2386_p2 = scmp.lt.u32.totalorder %s2379_s18, %s3398_s3 }
  0x19   : > { %p2695_p13 = pneg %p2679_p11 }
  0x1b   : > { %p2382_p0 = pnand %p2695_p13, %p2380_p12 }
  0x1d   : > { %p2383_p1 = pneg %p2382_p0 }
  0x1f   : > { %p2388_p3 = pnand %p2386_p2, %p2383_p1 }
  0x21   : > { %2391 = shalt.err (!%p2388_p3)
}
  0x22   : > { %s2392_s9 = scalar_lea.vmem %s2675_s10, 4096  ;;  %p2400_p5 = scmp.lt.s32.totalorder %s2675_s10, %s2675_s10 }
  0x23   : > { %p2393_p6 = scmp.ne.s32.totalorder %s2675_s10, %s2392_s9  ;;  %p2401_p8 = scmp.lt.s32.totalorder %s2392_s9, %s2392_s9 }
  0x25   : > { %p2395_p7 = pnand %p2393_p6, %p2695_p13  ;;  %p2402_p12 = por %p2401_p8, %p2400_p5 }
  0x27   : > { %p2396_p10 = pneg %p2395_p7 }
  0x29   : > { %p2403_p0 = pnand %p2402_p12, %p2396_p10 }
  0x2b   : > { %2406 = shalt.err (!%p2403_p0)
}
  0x2c   : > { %s2574_s12 = smov 128   ;;  %s2575_s14 = smov 8  }
  0x2d   : > { %2179 = dma.hbm_to_vmem [thread:$0]  (!%p2679_p11), %s3398_s3, 4096, %s2675_s10, [#allocation9], %s2574_s12, %s2574_s12, %s2575_s14  }
  0x2e   : > { %s2407_s20 = scalar_lea.hbm %s3397_s2, 2048 }
  0x2f   : > { %p2408_p5 = scmp.ne.s32.totalorder %s3397_s2, %s2407_s20  ;;  %p2414_p2 = scmp.lt.u32.totalorder %s2407_s20, %s3397_s2 }
  0x31   : > { %p2410_p8 = pnand %p2408_p5, %p2695_p13 }
  0x33   : > { %p2411_p1 = pneg %p2410_p8 }
  0x35   : > { %p2416_p3 = pnand %p2414_p2, %p2411_p1 }
  0x37   : > { %2419 = shalt.err (!%p2416_p3)
}
  0x38   : > { %s2420_s10 = scalar_lea.vmem %s2683_s13, 2048  ;;  %p2428_p12 = scmp.lt.s32.totalorder %s2683_s13, %s2683_s13 }
  0x39   : > { %p2421_p6 = scmp.ne.s32.totalorder %s2683_s13, %s2420_s10  ;;  %p2429_p0 = scmp.lt.s32.totalorder %s2420_s10, %s2420_s10 }
  0x3b   : > { %p2423_p7 = pnand %p2421_p6, %p2695_p13  ;;  %p2430_p5 = por %p2429_p0, %p2428_p12 }
  0x3d   : > { %p2424_p10 = pneg %p2423_p7 }
  0x3f   : > { %p2431_p8 = pnand %p2430_p5, %p2424_p10 }
  0x41   : > { %2434 = shalt.err (!%p2431_p8)
}
  0x42   : > { %2176 = dma.hbm_to_vmem [thread:$0]  (!%p2679_p11), %s3397_s2, 2048, %s2683_s13, [#allocation6], %s2574_s12, %s2574_s12, %s2575_s14  }
  0x43   : > { %s2435_s19 = scalar_lea.hbm %s3399_s4, 16 }
  0x44   : > { %p2436_p1 = scmp.ne.s32.totalorder %s3399_s4, %s2435_s19  ;;  %p2442_p6 = scmp.lt.u32.totalorder %s2435_s19, %s3399_s4 }
  0x46   : > { %p2438_p2 = pnand %p2436_p1, %p2695_p13 }
  0x48   : > { %p2439_p3 = pneg %p2438_p2 }
  0x4a   : > { %p2444_p7 = pnand %p2442_p6, %p2439_p3 }
  0x4c   : > { %2447 = shalt.err (!%p2444_p7)
}
  0x4d   : > { %s2448_s10 = scalar_lea.vmem %s231_s15, 16  ;;  %s2455_s13 = scalar_lea.vmem %s231_s15, 32 }
  0x4e   : > { %p2449_p10 = scmp.ne.s32.totalorder %s231_s15, %s2448_s10  ;;  %p2456_p5 = scmp.lt.s32.totalorder %s231_s15, %s231_s15 }
  0x4f   : > { %p2457_p8 = scmp.lt.s32.totalorder %s2455_s13, %s2448_s10 }
  0x50   : > { %p2451_p12 = pnand %p2449_p10, %p2695_p13 }
  0x51   : > { %p2458_p9 = por %p2457_p8, %p2456_p5 }
  0x52   : > { %p2452_p0 = pneg %p2451_p12 }
  0x54   : > { %p2459_p4 = pnand %p2458_p9, %p2452_p0 }
  0x56   : > { %2462 = shalt.err (!%p2459_p4)
}
  0x57   : > { %2182 = dma.hbm_to_vmem [thread:$0]  (!%p2679_p11), %s3399_s4, 16, %s231_s15, [#allocation9]  }
  0x58   : > { %s2576_s29 = smov [#allocation11]   ;;  %s2463_s19 = scalar_lea.hbm %s3400_s5, 16 }
  0x59   : > { %s241_s16 = sshll.u32 %s2576_s29, 4  ;;  %p2464_p1 = scmp.ne.s32.totalorder %s3400_s5, %s2463_s19  ;;  %s242_s16 = int_to_ptr.vmem [resolvable:$true] %s241_s16 }
  0x5a   : > { %p2470_p2 = scmp.lt.u32.totalorder %s2463_s19, %s3400_s5 }
  0x5b   : > { %p2466_p4 = pnand %p2464_p1, %p2695_p13 }
  0x5d   : > { %p2467_p9 = pneg %p2466_p4 }
  0x5f   : > { %p2472_p3 = pnand %p2470_p2, %p2467_p9 }
  0x61   : > { %2475 = shalt.err (!%p2472_p3)
}
  0x62   : > { %s2476_s15 = scalar_lea.vmem %s242_s16, 16  ;;  %s2483_s10 = scalar_lea.vmem %s242_s16, 32 }
  0x63   : > { %p2477_p6 = scmp.ne.s32.totalorder %s242_s16, %s2476_s15  ;;  %p2484_p12 = scmp.lt.s32.totalorder %s242_s16, %s242_s16 }
  0x64   : > { %p2485_p0 = scmp.lt.s32.totalorder %s2483_s10, %s2476_s15 }
  0x65   : > { %p2479_p7 = pnand %p2477_p6, %p2695_p13 }
  0x66   : > { %p2486_p5 = por %p2485_p0, %p2484_p12 }
  0x67   : > { %p2480_p10 = pneg %p2479_p7 }
  0x69   : > { %p2487_p8 = pnand %p2486_p5, %p2480_p10 }
  0x6b   : > { %2490 = shalt.err (!%p2487_p8)
}
  0x6c   : > { %2185 = dma.hbm_to_vmem [thread:$0]  (!%p2679_p11), %s3400_s5, 16, %s242_s16, [#allocation12]  }
  0x6d   : > { %p1954_p1 = scmp.ge.s32.totalorder %s2569_s24, 4 }
  0x6e   : > { %s2778_s21 = sand.u32 (!%p1954_p1), 1, %s2565_s23   ;;  %s1977_s14 = sshll.u32 (!%p1954_p1), %s2569_s24, 8 }
  0x6f   : > { %248 = sbr.rel (%p1954_p1) target bundleno = 151 (0x97), region = 32  ;;  %s1955_s29 = sshll.u32 (!%p1954_p1), %s2778_s21, 4 }
  0x70   : > { %s2785_s11 = scalar_lea.hbm (!%p1954_p1), %s3395_s0, %s1977_s14  ;;  %s256_s16 = scalar_lea.vmem (!%p1954_p1), [#allocation3], %s1955_s29 }
  0x71   : > { %s263_s19 = sshll.u32 (!%p1954_p1), %s256_s16, 4  ;;  %s253_s20 = scalar_lea.sflag (!%p1954_p1), [#allocation4], %s2778_s21  ;;  %s2787_s19 = int_to_ptr.vmem [resolvable:$true] %s263_s19 }
  0x72   : > { %s2491_s27 = scalar_lea.hbm (!%p1954_p1), %s2785_s11, 256  ;;  %p3412_p13 = scmp.ne.s32.totalorder (!%p1954_p1), %s3407_s30, 0 }
  0x73   : > { %p2492_p11 = scmp.ne.s32.totalorder (!%p1954_p1), %s2785_s11, %s2491_s27  ;;  %s2495_s15 = scalar_lea.hbm (!%p1954_p1), %s3395_s0, 1024 }
  0x74   : > { %p2496_p2 = scmp.lt.u32.totalorder (!%p1954_p1), %s2785_s11, %s3395_s0  ;;  %p2497_p3 = scmp.lt.u32.totalorder (!%p1954_p1), %s2495_s15, %s2491_s27 }
  0x75   : > { %p2493_p4 = pnand (!%p1954_p1), %p2492_p11, %p3412_p13  ;;  %p2499_p7 = scmp.lt.u32.totalorder (!%p1954_p1), %s2491_s27, %s2785_s11 }
  0x76   : > { %p2498_p6 = por %p2497_p3, %p2496_p2 }
  0x77   : > { %p2494_p9 = pneg %p2493_p4 }
  0x78   : > { %p2500_p10 = por %p2499_p7, %p2498_p6 }
  0x7a   : > { %p2501_p12 = pnand %p2500_p10, %p2494_p9 }
  0x7c   : > { %2504 = shalt.err (!%p2501_p12)
}
  0x7d   : > { %s2505_s12 = scalar_lea.vmem %s2787_s19, 256  ;;  %s2577_s14 = smov [#allocation3]  }
  0x7e   : > { %p2506_p0 = scmp.ne.s32.totalorder %s2787_s19, %s2505_s12  ;;  %s2509_s29 = sshll.u32 %s2577_s14, 4  ;;  %s2510_s29 = int_to_ptr.vmem [resolvable:$false] %s2509_s29 }
  0x7f   : > { %s2511_s17 = scalar_lea.vmem %s2510_s29, 512  ;;  %p2512_p1 = scmp.lt.s32.totalorder %s2787_s19, %s2510_s29 }
  0x80   : > { %p2507_p5 = pnand %p2506_p0, %p3412_p13  ;;  %p2513_p11 = scmp.lt.s32.totalorder %s2511_s17, %s2505_s12 }
  0x82   : > { %p2508_p8 = pneg %p2507_p5  ;;  %p2514_p4 = por %p2513_p11, %p2512_p1 }
  0x84   : > { %p2515_p2 = pnand %p2514_p4, %p2508_p8 }
  0x86   : > { %2518 = shalt.err (!%p2515_p2)
}
  0x87   : > { %s2578_s18 = smov 128   ;;  %s2579_s16 = smov 8  }
  0x88   : > { %2154 = dma.hbm_to_vmem [thread:$0]  (%p3412_p13), %s2785_s11, 256, %s2787_s19, %s253_s20, %s2578_s18, %s2578_s18, %s2579_s16  }
  0x89   : > { %s273_s27 = sand.u32 1, %s2569_s24   ;;  %s1958_s28 = sshll.u32 %s2778_s21, 10 }
  0x8a   : > { %s1979_s9 = sshll.u32 %s2569_s24, 9  ;;  %s277_s12 = scalar_lea.vmem [#allocation5], %s1958_s28 }
  0x8b   : > { %s284_s13 = scalar_lea.hbm %s3396_s1, %s1979_s9  ;;  %s297_s14 = sshll.u32 %s277_s12, 4  ;;  %s298_s14 = int_to_ptr.vmem [resolvable:$true] %s297_s14 }
  0x8c   : > { %s2155_s11 = scalar_select %p3412_p13, [#allocation0], [#allocation15] }
  0x8d   : > { %s2580_s20 = smov 2048   ;;  %s2581_s29 = smov 512  }
  0x8e   : > { %s289_s19 = sld [smem:[%s2155_s11]]   ;;  %s2582_s21 = smov 2  }
  0x8f   : > { %2156 = sst [smem:[#allocation14]] (%p3412_p13), %s2580_s20  ;;  %s2583_s24 = smov 256  }
  0x90   : > { %2157 = sst [smem:[#allocation14 + $0x1]] (%p3412_p13), %s2581_s29  ;;  %s2584_s17 = smov 16  }
  0x91   : > { %2158 = sst [smem:[#allocation14 + $0x2]] (%p3412_p13), %s2582_s21  ;;  %s274_s28 = scalar_lea.sflag [#allocation6], %s273_s27 }
  0x92   : > { %2159 = sst [smem:[#allocation14 + $0x3]] (%p3412_p13), %s2583_s24  ;;  %s2585_s9 = smov [#allocation13]  }
  0x93   : > { %2160 = sst [smem:[#allocation14 + $0x4]] (%p3412_p13), %s2583_s24 }
  0x94   : > { %2161 = sst [smem:[#allocation14 + $0x5]] (%p3412_p13), %s2584_s17  ;;  %s1962_s18 = sshll.u32 %s289_s19, 26 }
  0x95   : > { %s1963_s16 = sadd.s32 134217728, %s1962_s18 }
  0x96   : > { %2162 = dma.general (%p3412_p13), %s284_s13, 16384, %s298_s14, %s274_s28, %s2585_s9, [#allocation14], %s1963_s16, 0  }
  0x97 PF: > { %p3413_p9 = scmp.ne.s32.totalorder %s3409_s8, 0 }
  0x98   : > { %s324_s15 = sand.u32 (!%p3413_p9), 1, %s2561_s22   ;;  %p3414_p3 = scmp.ne.s32.totalorder (!%p3413_p9), %s3408_s7, 0 }
  0x99   : > { %322 = sbr.rel (%p3413_p9) target bundleno = 840 (0x348), region = 44  ;;  %s1965_s10 = sshll.u32 (!%p3413_p9), %s324_s15, 4 }
  0x9a   : > { %s325_s12 = scalar_lea.sflag (!%p3413_p9), [#allocation4], %s324_s15  ;;  %s2838_s11 = scalar_lea.vmem (!%p3413_p9), [#allocation3], %s1965_s10 }
  0xa0   : > { %2536 = dma.done.wait (%p3414_p3), %s325_s12, 256  }
  0xa1   : > { %2538 = vsyncadd (%p3414_p3), %s325_s12, 4294967040  ;;  %s333_s30 = sand.u32 1, %s2641_s25   ;;  %s1966_s27 = sshll.u32 %s324_s15, 10 }
  0xa2   : > { %s334_s13 = scalar_lea.sflag [#allocation6], %s333_s30  ;;  %s2845_s14 = scalar_lea.vmem [#allocation5], %s1966_s27 }
  0xa3   : > { %2540 = dma.done.wait (%p3414_p3), %s334_s13, 16384  }
  0xa4   : > { %2542 = vsyncadd (%p3414_p3), %s334_s13, 4294950912  ;;  %p3415_p13 = scmp.eq.s32.totalorder %s2641_s25, 0 }
  0xa6   : > { %2544 = dma.done.wait (%p3415_p13), [#allocation6], 2048   ;;  %p3416_p6 = pmov %p3415_p13 }
  0xa8   : > { %2546 = vsyncadd (%p3416_p6), [#allocation6], 4294965248  ;;  %p3417_p7 = pmov %p3416_p6 }
  0xa9   : > { %p3418_p10 = pmov %p3416_p6 }
  0xaa   : > { %2548 = dma.done.wait (%p3417_p7), [#allocation9], 4112  }
  0xab   : > { %2550 = vsyncadd (%p3418_p10), [#allocation9], 4294963184  ;;  %p3419_p12 = pmov %p3416_p6 }
  0xac   : > { %p3420_p0 = pmov %p3416_p6 }
  0xad   : > { %2552 = dma.done.wait (%p3419_p12), [#allocation12], 16  }
  0xae   : > { %2554 = vsyncadd (%p3420_p0), [#allocation12], 4294967280  ;;  %v2586_v0 = vmov 0.0|0.0   ;;  %v396_v1 = vld [vmem:[#allocation7] sm:$0xff]  ;;  %v397_v2 = vld [vmem:[#allocation7 + $0x8] sm:$0xff]  ;;  %vm1441_vm0 = vcmask 130112  }
  0xaf   : > { %2114 = vmatprep.subr.bf16.mxu1 %v2586_v0  ;;  %v623_v3 = vld [vmem:[#allocation8] sm:$0xff]  ;;  %v2034_v4 = vpack.c.bf16 %v397_v2, %v396_v1  ;;  %v624_v5 = vld [vmem:[#allocation8 + $0x8] sm:$0xff]  ;;  %v398_v6 = vld [vmem:[#allocation7 + $0x10] sm:$0xff]  ;;  %vm1722_vm1 = vcmask 1041409   ;;  %vm1724_vm2 = vcmask 1042434   ;;  %vm1726_vm3 = vcmask 1043459  }
  0xb0   : > { %v399_v7 = vld [vmem:[#allocation7 + $0x18] sm:$0xff]  ;;  %v2864_v8 = vpack.c.bf16 %v624_v5, %v623_v3  ;;  %v625_v10 = vld [vmem:[#allocation8 + $0x10] sm:$0xff]  ;;  %v400_v12 = vld [vmem:[#allocation7 + $0x20] sm:$0xff]  ;;  %vm1728_vm4 = vcmask 1044484   ;;  %vm1730_vm5 = vcmask 1045509   ;;  %vm1732_vm6 = vcmask 1046534  }
  0xb1   : > { %v2038_v9 = vpack.c.bf16 %v399_v7, %v398_v6  ;;  %v626_v11 = vld [vmem:[#allocation8 + $0x18] sm:$0xff]  ;;  %2035 = vmatprep.subr.bf16.mxu0 %v2034_v4  ;;  %v401_v13 = vld [vmem:[#allocation7 + $0x28] sm:$0xff]  ;;  %v627_v16 = vld [vmem:[#allocation8 + $0x20] sm:$0xff]  ;;  %vm1734_vm7 = vcmask 1047559   ;;  %vm1761_vm8 = vcmask 130048   ;;  %p389_p5 = scmp.lt.s32.totalorder %s2641_s25, 3 }
  0xb2   : > { %2130 = vmatpush1.bf16.msra.mxu1 %v2864_v8  ;;  %2037 = vmatpush3.bf16.msra.mxu0 %v2034_v4  ;;  %v2867_v14 = vpack.c.bf16 %v626_v11, %v625_v10  ;;  %v2042_v15 = vpack.c.bf16 %v401_v13, %v400_v12  ;;  %v628_v17 = vld [vmem:[#allocation8 + $0x28] sm:$0xff]  ;;  %v402_v18 = vld [vmem:[#allocation7 + $0x30] sm:$0xff]  ;;  %v403_v19 = vld [vmem:[#allocation7 + $0x38] sm:$0xff] }
  0xb3   : > { %2115 = vmatprep.subr.bf16.mxu1 %v2586_v0  ;;  %2039 = vmatprep.subr.bf16.mxu0 %v2038_v9  ;;  %v2871_v20 = vpack.c.bf16 %v628_v17, %v627_v16  ;;  %v2046_v21 = vpack.c.bf16 %v403_v19, %v402_v18  ;;  %v629_v22 = vld [vmem:[#allocation8 + $0x30] sm:$0xff]  ;;  %v630_v23 = vld [vmem:[#allocation8 + $0x38] sm:$0xff]  ;;  %v404_v24 = vld [vmem:[#allocation7 + $0x40] sm:$0xff]  ;;  %s3427_s25 = smov (!%p389_p5, %s2641_s25), 3 }
  0xb4   : > { %v405_v25 = vld [vmem:[#allocation7 + $0x48] sm:$0xff]  ;;  %v394_v26 = vld [vmem:[%s2838_s11] sm:$0xff]  ;;  %v2876_v27 = vpack.c.bf16 %v630_v23, %v629_v22  ;;  %v407_v32 = vld [vmem:[#allocation7 + $0x58] sm:$0xff]  ;;  %s1980_s7 = sshll.u32 %s3427_s25, 5 }
  0xb5   : > { %2031 = vmatprep.mubr.f32.mxu0 %v394_v26  ;;  %v2050_v28 = vpack.c.bf16 %v405_v25, %v404_v24  ;;  %v631_v29 = vld [vmem:[#allocation8 + $0x40] sm:$0xff]  ;;  %v632_v30 = vld [vmem:[#allocation8 + $0x48] sm:$0xff]  ;;  %v406_v31 = vld [vmem:[#allocation7 + $0x50] sm:$0xff]  ;;  %s393_s20 = scalar_lea.vmem %s3401_s6, %s1980_s7 }
  0xb6   : > { %2131 = vmatpush1.bf16.msra.mxu1 %v2867_v14  ;;  %2041 = vmatpush3.bf16.msra.mxu0 %v2038_v9  ;;  %v2880_v33 = vpack.c.bf16 %v632_v30, %v631_v29  ;;  %v552_v34 = vld [vmem:[%s2845_s14 + $0x1c8] sm:$0xff]  ;;  %v2054_v35 = vpack.c.bf16 %v407_v32, %v406_v31  ;;  %v633_v36 = vld [vmem:[#allocation8 + $0x50] sm:$0xff]  ;;  %v634_v37 = vld [vmem:[#allocation8 + $0x58] sm:$0xff] }
  0xb7   : > { %2116 = vmatprep.subr.bf16.mxu1 %v2586_v0  ;;  %2043 = vmatprep.subr.bf16.mxu0 %v2042_v15  ;;  %v408_v38 = vld [vmem:[#allocation7 + $0x60] sm:$0xff]  ;;  %v409_v39 = vld [vmem:[#allocation7 + $0x68] sm:$0xff]  ;;  %v2885_v40 = vpack.c.bf16 %v634_v37, %v633_v36  ;;  %v410_v44 = vld [vmem:[#allocation7 + $0x70] sm:$0xff] }
  0xb8   : > { %859 = vmatprep.mubr.f32.mxu1 %v552_v34  ;;  %v2058_v41 = vpack.c.bf16 %v409_v39, %v408_v38  ;;  %v635_v42 = vld [vmem:[#allocation8 + $0x60] sm:$0xff]  ;;  %v636_v43 = vld [vmem:[#allocation8 + $0x68] sm:$0xff]  ;;  %v411_v45 = vld [vmem:[#allocation7 + $0x78] sm:$0xff] }
  0xb9   : > { %v2889_v46 = vpack.c.bf16 %v636_v43, %v635_v42  ;;  %v2062_v47 = vpack.c.bf16 %v411_v45, %v410_v44  ;;  %v637_v48 = vld [vmem:[#allocation8 + $0x70] sm:$0xff]  ;;  %v638_v49 = vld [vmem:[#allocation8 + $0x78] sm:$0xff]  ;;  %v639_v51 = vld [vmem:[#allocation8 + $0x80] sm:$0xff] }
  0xba   : > { %2132 = vmatpush1.bf16.msra.mxu1 %v2871_v20  ;;  %2045 = vmatpush3.bf16.msra.mxu0 %v2042_v15  ;;  %v2893_v50 = vpack.c.bf16 %v638_v49, %v637_v48  ;;  %v640_v52 = vld [vmem:[#allocation8 + $0x88] sm:$0xff]  ;;  %v641_v55 = vld [vmem:[#allocation8 + $0x90] sm:$0xff]  ;;  %v642_v56 = vld [vmem:[#allocation8 + $0x98] sm:$0xff] }
  0xbb   : > { %2117 = vmatprep.subr.bf16.mxu1 %v2586_v0  ;;  %2047 = vmatprep.subr.bf16.mxu0 %v2046_v21  ;;  %v395_v53 = vld [vmem:[%s2838_s11 + $0x8] sm:$0xff]  ;;  %v2091_v54 = vpack.c.bf16 %v640_v52, %v639_v51  ;;  %v2094_v58 = vpack.c.bf16 %v642_v56, %v641_v55  ;;  %v643_v59 = vld [vmem:[#allocation8 + $0xa0] sm:$0xff]  ;;  %v645_v62 = vld [vmem:[#allocation8 + $0xb0] sm:$0xff] }
  0xbc   : > { %v496_v57 = vld [vmem:[%s2845_s14 + $0x8] sm:$0xff]  ;;  %v646_v63 = vld [vmem:[#allocation8 + $0xb8] sm:$0xff]  ;;  %v647_v2 = vld [vmem:[#allocation8 + $0xc0] sm:$0xff] }
  0xbd   : > { %v644_v60 = vld [vmem:[#allocation8 + $0xa8] sm:$0xff]  ;;  %v2100_v1 = vpack.c.bf16 %v646_v63, %v645_v62  ;;  %v649_v5 = vld [vmem:[#allocation8 + $0xd0] sm:$0xff]  ;;  %v650_v6 = vld [vmem:[#allocation8 + $0xd8] sm:$0xff] }
  0xbe   : > { %2133 = vmatpush1.bf16.msra.mxu1 %v2876_v27  ;;  %2049 = vmatpush3.bf16.msra.mxu0 %v2046_v21  ;;  %v2097_v61 = vpack.c.bf16 %v644_v60, %v643_v59  ;;  %v648_v3 = vld [vmem:[#allocation8 + $0xc8] sm:$0xff]  ;;  %v2106_v7 = vpack.c.bf16 %v650_v6, %v649_v5  ;;  %v653_v11 = vld [vmem:[#allocation8 + $0xf0] sm:$0xff]  ;;  %v654_v12 = vld [vmem:[#allocation8 + $0xf8] sm:$0xff] }
  0xbf   : > { %2118 = vmatprep.subr.bf16.mxu1 %v2586_v0  ;;  %2051 = vmatprep.subr.bf16.mxu0 %v2050_v28  ;;  %v2103_v4 = vpack.c.bf16 %v648_v3, %v647_v2  ;;  %v652_v9 = vld [vmem:[#allocation8 + $0xe8] sm:$0xff]  ;;  %v2112_v13 = vpack.c.bf16 %v654_v12, %v653_v11  ;;  %v554_v15 = vld [vmem:[%s2845_s14 + $0x1d8] sm:$0xff]  ;;  %v553_v16 = vld [vmem:[%s2845_s14 + $0x1d0] sm:$0xff] }
  0xc0   : > { %v556_v17 = vld [vmem:[%s2845_s14 + $0x1e8] sm:$0xff]  ;;  %v555_v18 = vld [vmem:[%s2845_s14 + $0x1e0] sm:$0xff]  ;;  %v558_v19 = vld [vmem:[%s2845_s14 + $0x1f8] sm:$0xff] }
  0xc1   : > { %v560_v21 = vld [vmem:[%s2845_s14 + $0x208] sm:$0xff]  ;;  %v559_v22 = vld [vmem:[%s2845_s14 + $0x200] sm:$0xff]  ;;  %v562_v23 = vld [vmem:[%s2845_s14 + $0x218] sm:$0xff] }
  0xc2   : > { %2134 = vmatpush1.bf16.msra.mxu1 %v2880_v33  ;;  %2053 = vmatpush3.bf16.msra.mxu0 %v2050_v28  ;;  %v561_v24 = vld [vmem:[%s2845_s14 + $0x210] sm:$0xff]  ;;  %v564_v25 = vld [vmem:[%s2845_s14 + $0x228] sm:$0xff]  ;;  %v563_v26 = vld [vmem:[%s2845_s14 + $0x220] sm:$0xff] }
  0xc3   : > { %2119 = vmatprep.subr.bf16.mxu1 %v2586_v0  ;;  %2055 = vmatprep.subr.bf16.mxu0 %v2054_v35  ;;  %v565_v28 = vld [vmem:[%s2845_s14 + $0x230] sm:$0xff]  ;;  %v568_v29 = vld [vmem:[%s2845_s14 + $0x248] sm:$0xff]  ;;  %v567_v30 = vld [vmem:[%s2845_s14 + $0x240] sm:$0xff] }
  0xc4   : > { %v495_v31 = vld [vmem:[%s2845_s14] sm:$0xff]  ;;  %v570_v32 = vld [vmem:[%s2845_s14 + $0x258] sm:$0xff]  ;;  %v569_v34 = vld [vmem:[%s2845_s14 + $0x250] sm:$0xff] }
  0xc5   : > { %v500_v36 = vld [vmem:[%s2845_s14 + $0x28] sm:$0xff]  ;;  %v571_v37 = vld [vmem:[%s2845_s14 + $0x260] sm:$0xff]  ;;  %v574_v39 = vld [vmem:[%s2845_s14 + $0x278] sm:$0xff] }
  0xc6   : > { %2135 = vmatpush1.bf16.msra.mxu1 %v2885_v40  ;;  %2057 = vmatpush3.bf16.msra.mxu0 %v2054_v35  ;;  %v572_v35 = vld [vmem:[%s2845_s14 + $0x268] sm:$0xff]  ;;  %v499_v38 = vld [vmem:[%s2845_s14 + $0x20] sm:$0xff]  ;;  %v501_v42 = vld [vmem:[%s2845_s14 + $0x30] sm:$0xff] }
  0xc7   : > { %2120 = vmatprep.subr.bf16.mxu1 %v2586_v0  ;;  %2059 = vmatprep.subr.bf16.mxu0 %v2058_v41  ;;  %v576_v43 = vld [vmem:[%s2845_s14 + $0x288] sm:$0xff]  ;;  %v575_v45 = vld [vmem:[%s2845_s14 + $0x280] sm:$0xff]  ;;  %v506_v48 = vld [vmem:[%s2845_s14 + $0x58] sm:$0xff] }
  0xc8   : > { %v504_v44 = vld [vmem:[%s2845_s14 + $0x48] sm:$0xff]  ;;  %v577_v49 = vld [vmem:[%s2845_s14 + $0x290] sm:$0xff]  ;;  %v582_v55 = vld [vmem:[%s2845_s14 + $0x2b8] sm:$0xff] }
  0xc9   : > { %v580_v51 = vld [vmem:[%s2845_s14 + $0x2a8] sm:$0xff]  ;;  %v510_v56 = vld [vmem:[%s2845_s14 + $0x78] sm:$0xff]  ;;  %v511_v62 = vld [vmem:[%s2845_s14 + $0x80] sm:$0xff] }
  0xca   : > { %2136 = vmatpush1.bf16.msra.mxu1 %v2889_v46  ;;  %2061 = vmatpush3.bf16.msra.mxu0 %v2058_v41  ;;  %v573_v41 = vld [vmem:[%s2845_s14 + $0x270] sm:$0xff]  ;;  %v508_v52 = vld [vmem:[%s2845_s14 + $0x68] sm:$0xff]  ;;  %v586_v63 = vld [vmem:[%s2845_s14 + $0x2d8] sm:$0xff] }
  0xcb   : > { %2121 = vmatprep.subr.bf16.mxu1 %v2586_v0  ;;  %2063 = vmatprep.subr.bf16.mxu0 %v2062_v47  ;;  %v584_v59 = vld [vmem:[%s2845_s14 + $0x2c8] sm:$0xff]  ;;  %v585_v2 = vld [vmem:[%s2845_s14 + $0x2d0] sm:$0xff]  ;;  %v587_v6 = vld [vmem:[%s2845_s14 + $0x2e0] sm:$0xff] }
  0xcc   : > { %v512_v60 = vld [vmem:[%s2845_s14 + $0x88] sm:$0xff]  ;;  %v513_v3 = vld [vmem:[%s2845_s14 + $0x90] sm:$0xff] }
  0xcd   : > { %v516_v5 = vld [vmem:[%s2845_s14 + $0xa8] sm:$0xff]  ;;  %v517_v11 = vld [vmem:[%s2845_s14 + $0xb0] sm:$0xff] }
  0xce   : > { %2137 = vmatpush1.bf16.msra.mxu1 %v2893_v50  ;;  %2065 = vmatpush3.bf16.msra.mxu0 %v2062_v47  ;;  %v578_v47 = vld [vmem:[%s2845_s14 + $0x298] sm:$0xff]  ;;  %v592_v12 = vld [vmem:[%s2845_s14 + $0x308] sm:$0xff] }
  0xcf   : > { %2122 = vmatprep.subr.bf16.mxu1 %v2586_v0  ;;  %2066 = vmatprep.subr.bf16.mxu0 %v2586_v0 }
  0xd1   : > { %2032 = vmatmul.mubr.f32.vlgmr.msra.gmra.mrb[0].mxu0 %v395_v53  ;;  %v579_v53 = vld [vmem:[%s2845_s14 + $0x2a0] sm:$0xff] }
  0xd2   : > { %2138 = vmatpush1.bf16.msra.mxu1 %v2091_v54  ;;  %2068 = vmatpush1.bf16.msra.mxu0 %v2864_v8  ;;  %v651_v8 = vld [vmem:[#allocation8 + $0xe0] sm:$0xff] }
  0xd3   : > { %2123 = vmatprep.subr.bf16.mxu1 %v2586_v0  ;;  %2069 = vmatprep.subr.bf16.mxu0 %v2586_v0  ;;  %v2109_v10 = vpack.c.bf16 %v652_v9, %v651_v8  ;;  %v590_v8 = vld [vmem:[%s2845_s14 + $0x2f8] sm:$0xff] }
  0xd4   : > { %719 = vmatprep.mubr.f32.mxu0 %v496_v57  ;;  %v581_v57 = vld [vmem:[%s2845_s14 + $0x2b0] sm:$0xff]  ;;  %v518_v9 = vld [vmem:[%s2845_s14 + $0xb8] sm:$0xff] }
  0xd6   : > { %2139 = vmatpush1.bf16.msra.mxu1 %v2094_v58  ;;  %2071 = vmatpush1.bf16.msra.mxu0 %v2867_v14  ;;  %v551_v14 = vld [vmem:[%s2845_s14 + $0x1c0] sm:$0xff] }
  0xd7   : > { %2124 = vmatprep.subr.bf16.mxu1 %v2586_v0  ;;  %2072 = vmatprep.subr.bf16.mxu0 %v2586_v0 }
  0xda   : > { %2140 = vmatpush1.bf16.msra.mxu1 %v2097_v61  ;;  %2074 = vmatpush1.bf16.msra.mxu0 %v2871_v20  ;;  %v557_v20 = vld [vmem:[%s2845_s14 + $0x1f0] sm:$0xff] }
  0xdb   : > { %2125 = vmatprep.subr.bf16.mxu1 %v2586_v0  ;;  %2075 = vmatprep.subr.bf16.mxu0 %v2586_v0 }
  0xde   : > { %2141 = vmatpush1.bf16.msra.mxu1 %v2100_v1  ;;  %2077 = vmatpush1.bf16.msra.mxu0 %v2876_v27  ;;  %v566_v27 = vld [vmem:[%s2845_s14 + $0x238] sm:$0xff] }
  0xdf   : > { %2126 = vmatprep.subr.bf16.mxu1 %v2586_v0  ;;  %2078 = vmatprep.subr.bf16.mxu0 %v2586_v0 }
  0xe2   : > { %2142 = vmatpush1.bf16.msra.mxu1 %v2103_v4  ;;  %2080 = vmatpush1.bf16.msra.mxu0 %v2880_v33  ;;  %v498_v33 = vld [vmem:[%s2845_s14 + $0x18] sm:$0xff] }
  0xe3   : > { %2127 = vmatprep.subr.bf16.mxu1 %v2586_v0  ;;  %2081 = vmatprep.subr.bf16.mxu0 %v2586_v0 }
  0xe6   : > { %2143 = vmatpush1.bf16.msra.mxu1 %v2106_v7  ;;  %2083 = vmatpush1.bf16.msra.mxu0 %v2885_v40  ;;  %v502_v40 = vld [vmem:[%s2845_s14 + $0x38] sm:$0xff] }
  0xe7   : > { %2128 = vmatprep.subr.bf16.mxu1 %v2586_v0  ;;  %2084 = vmatprep.subr.bf16.mxu0 %v2586_v0 }
  0xea   : > { %2144 = vmatpush1.bf16.msra.mxu1 %v2109_v10  ;;  %2086 = vmatpush1.bf16.msra.mxu0 %v2889_v46  ;;  %v503_v46 = vld [vmem:[%s2845_s14 + $0x40] sm:$0xff] }
  0xeb   : > { %2129 = vmatprep.subr.bf16.mxu1 %v2586_v0  ;;  %2087 = vmatprep.subr.bf16.mxu0 %v2586_v0 }
  0xee   : > { %2145 = vmatpush1.bf16.msra.mxu1 %v2112_v13  ;;  %2089 = vmatpush1.bf16.msra.mxu0 %v2893_v50  ;;  %v505_v50 = vld [vmem:[%s2845_s14 + $0x50] sm:$0xff] }
  0xef   : > { %2090 = vmatprep.subr.bf16.mxu0 %v2586_v0 }
  0xf1   : > { %860 = vmatmul.mubr.f32.vlgmr.msra.gmra.mrb[0].mxu1 %v551_v14  ;;  %v591_v14 = vld [vmem:[%s2845_s14 + $0x300] sm:$0xff] }
  0xf2   : > { %2092 = vmatpush1.bf16.msra.mxu0 %v2091_v54  ;;  %864 = vmatprep.mubr.f32.mxu1 %v554_v15  ;;  %v507_v54 = vld [vmem:[%s2845_s14 + $0x60] sm:$0xff] }
  0xf3   : > { %2093 = vmatprep.subr.bf16.mxu0 %v2586_v0  ;;  %v519_v15 = vld [vmem:[%s2845_s14 + $0xc0] sm:$0xff] }
  0xf5   : > { %865 = vmatmul.mubr.f32.gmra.mrb[2].mxu1 %v553_v16  ;;  %v594_v16 = vld [vmem:[%s2845_s14 + $0x318] sm:$0xff] }
  0xf6   : > { %2095 = vmatpush1.bf16.msra.mxu0 %v2094_v58  ;;  %869 = vmatprep.mubr.f32.mxu1 %v556_v17  ;;  %v509_v58 = vld [vmem:[%s2845_s14 + $0x70] sm:$0xff]  ;;  %v522_v17 = vld [vmem:[%s2845_s14 + $0xd8] sm:$0xff] }
  0xf7   : > { %2096 = vmatprep.subr.bf16.mxu0 %v2586_v0 }
  0xf9   : > { %870 = vmatmul.mubr.f32.gmra.mrb[4].mxu1 %v555_v18  ;;  %v593_v18 = vld [vmem:[%s2845_s14 + $0x310] sm:$0xff] }
  0xfa   : > { %2098 = vmatpush1.bf16.msra.mxu0 %v2097_v61  ;;  %874 = vmatprep.mubr.f32.mxu1 %v558_v19  ;;  %v583_v61 = vld [vmem:[%s2845_s14 + $0x2c0] sm:$0xff]  ;;  %v521_v19 = vld [vmem:[%s2845_s14 + $0xd0] sm:$0xff] }
  0xfb   : > { %2099 = vmatprep.subr.bf16.mxu0 %v2586_v0 }
  0xfd   : > { %875 = vmatmul.mubr.f32.gmra.mrb[6].mxu1 %v557_v20  ;;  %v596_v20 = vld [vmem:[%s2845_s14 + $0x328] sm:$0xff] }
  0xfe   : > { %2101 = vmatpush1.bf16.msra.mxu0 %v2100_v1  ;;  %879 = vmatprep.mubr.f32.mxu1 %v560_v21  ;;  %v514_v1 = vld [vmem:[%s2845_s14 + $0x98] sm:$0xff]  ;;  %v524_v21 = vld [vmem:[%s2845_s14 + $0xe8] sm:$0xff] }
  0xff   : > { %2102 = vmatprep.subr.bf16.mxu0 %v2586_v0 }
 0x101   : > { %880 = vmatmul.mubr.f32.gmra.mrb[8].mxu1 %v559_v22  ;;  %v595_v22 = vld [vmem:[%s2845_s14 + $0x320] sm:$0xff] }
 0x102   : > { %2104 = vmatpush1.bf16.msra.mxu0 %v2103_v4  ;;  %884 = vmatprep.mubr.f32.mxu1 %v562_v23  ;;  %v588_v4 = vld [vmem:[%s2845_s14 + $0x2e8] sm:$0xff]  ;;  %v523_v23 = vld [vmem:[%s2845_s14 + $0xe0] sm:$0xff] }
 0x103   : > { %2105 = vmatprep.subr.bf16.mxu0 %v2586_v0 }
 0x105   : > { %885 = vmatmul.mubr.f32.gmra.mrb[10].mxu1 %v561_v24  ;;  %v598_v24 = vld [vmem:[%s2845_s14 + $0x338] sm:$0xff] }
 0x106   : > { %2107 = vmatpush1.bf16.msra.mxu0 %v2106_v7  ;;  %889 = vmatprep.mubr.f32.mxu1 %v564_v25  ;;  %v515_v7 = vld [vmem:[%s2845_s14 + $0xa0] sm:$0xff]  ;;  %v526_v25 = vld [vmem:[%s2845_s14 + $0xf8] sm:$0xff] }
 0x107   : > { %2108 = vmatprep.subr.bf16.mxu0 %v2586_v0 }
 0x109   : > { %890 = vmatmul.mubr.f32.gmra.mrb[12].mxu1 %v563_v26  ;;  %v597_v26 = vld [vmem:[%s2845_s14 + $0x330] sm:$0xff] }
 0x10a   : > { %2110 = vmatpush1.bf16.msra.mxu0 %v2109_v10  ;;  %894 = vmatprep.mubr.f32.mxu1 %v566_v27  ;;  %v589_v10 = vld [vmem:[%s2845_s14 + $0x2f0] sm:$0xff] }
 0x10b   : > { %2111 = vmatprep.subr.bf16.mxu0 %v2586_v0  ;;  %v497_v0 = vld [vmem:[%s2845_s14 + $0x10] sm:$0xff] }
 0x10c   : > { %v525_v27 = vld [vmem:[%s2845_s14 + $0xf0] sm:$0xff] }
 0x10d   : > { %895 = vmatmul.mubr.f32.gmra.mrb[14].mxu1 %v565_v28  ;;  %v600_v28 = vld [vmem:[%s2845_s14 + $0x348] sm:$0xff] }
 0x10e   : > { %2113 = vmatpush1.bf16.msra.mxu0 %v2112_v13  ;;  %899 = vmatprep.mubr.f32.mxu1 %v568_v29  ;;  %v520_v13 = vld [vmem:[%s2845_s14 + $0xc8] sm:$0xff] }
 0x10f   : > { %v528_v29 = vld [vmem:[%s2845_s14 + $0x108] sm:$0xff] }
 0x111   : > { %900 = vmatmul.mubr.f32.gmra.mrb[16].mxu1 %v567_v30  ;;  %720 = vmatmul.mubr.f32.vlgmr.msra.gmra.mrb[2].mxu0 %v495_v31  ;;  %v599_v30 = vld [vmem:[%s2845_s14 + $0x340] sm:$0xff] }
 0x112   : > { %904 = vmatprep.mubr.f32.mxu1 %v570_v32  ;;  %724 = vmatprep.mubr.f32.mxu0 %v498_v33  ;;  %v527_v31 = vld [vmem:[%s2845_s14 + $0x100] sm:$0xff]  ;;  %v602_v32 = vld [vmem:[%s2845_s14 + $0x358] sm:$0xff] }
 0x113   : > { %v530_v33 = vld [vmem:[%s2845_s14 + $0x118] sm:$0xff] }
 0x115   : > { %905 = vmatmul.mubr.f32.gmra.mrb[18].mxu1 %v569_v34  ;;  %725 = vmatmul.mubr.f32.gmra.mrb[4].mxu0 %v497_v0  ;;  %v601_v34 = vld [vmem:[%s2845_s14 + $0x350] sm:$0xff] }
 0x116   : > { %909 = vmatprep.mubr.f32.mxu1 %v572_v35  ;;  %729 = vmatprep.mubr.f32.mxu0 %v500_v36  ;;  %v529_v0 = vld [vmem:[%s2845_s14 + $0x110] sm:$0xff]  ;;  %v604_v35 = vld [vmem:[%s2845_s14 + $0x368] sm:$0xff] }
 0x117   : > { %v532_v36 = vld [vmem:[%s2845_s14 + $0x128] sm:$0xff] }
 0x119   : > { %910 = vmatmul.mubr.f32.gmra.mrb[20].mxu1 %v571_v37  ;;  %730 = vmatmul.mubr.f32.gmra.mrb[6].mxu0 %v499_v38  ;;  %v603_v37 = vld [vmem:[%s2845_s14 + $0x360] sm:$0xff] }
 0x11a   : > { %914 = vmatprep.mubr.f32.mxu1 %v574_v39  ;;  %734 = vmatprep.mubr.f32.mxu0 %v502_v40  ;;  %v531_v38 = vld [vmem:[%s2845_s14 + $0x120] sm:$0xff]  ;;  %v606_v39 = vld [vmem:[%s2845_s14 + $0x378] sm:$0xff] }
 0x11b   : > { %v534_v40 = vld [vmem:[%s2845_s14 + $0x138] sm:$0xff] }
 0x11d   : > { %915 = vmatmul.mubr.f32.gmra.mrb[22].mxu1 %v573_v41  ;;  %735 = vmatmul.mubr.f32.gmra.mrb[8].mxu0 %v501_v42  ;;  %v605_v41 = vld [vmem:[%s2845_s14 + $0x370] sm:$0xff] }
 0x11e   : > { %919 = vmatprep.mubr.f32.mxu1 %v576_v43  ;;  %739 = vmatprep.mubr.f32.mxu0 %v504_v44  ;;  %v533_v42 = vld [vmem:[%s2845_s14 + $0x130] sm:$0xff]  ;;  %v608_v43 = vld [vmem:[%s2845_s14 + $0x388] sm:$0xff] }
 0x11f   : > { %v536_v44 = vld [vmem:[%s2845_s14 + $0x148] sm:$0xff] }
 0x121   : > { %920 = vmatmul.mubr.f32.gmra.mrb[24].mxu1 %v575_v45  ;;  %740 = vmatmul.mubr.f32.gmra.mrb[10].mxu0 %v503_v46  ;;  %v607_v45 = vld [vmem:[%s2845_s14 + $0x380] sm:$0xff] }
 0x122   : > { %924 = vmatprep.mubr.f32.mxu1 %v578_v47  ;;  %744 = vmatprep.mubr.f32.mxu0 %v506_v48  ;;  %v535_v46 = vld [vmem:[%s2845_s14 + $0x140] sm:$0xff]  ;;  %v610_v47 = vld [vmem:[%s2845_s14 + $0x398] sm:$0xff] }
 0x123   : > { %v538_v48 = vld [vmem:[%s2845_s14 + $0x158] sm:$0xff] }
 0x125   : > { %925 = vmatmul.mubr.f32.gmra.mrb[26].mxu1 %v577_v49  ;;  %745 = vmatmul.mubr.f32.gmra.mrb[12].mxu0 %v505_v50  ;;  %v609_v49 = vld [vmem:[%s2845_s14 + $0x390] sm:$0xff] }
 0x126   : > { %929 = vmatprep.mubr.f32.mxu1 %v580_v51  ;;  %749 = vmatprep.mubr.f32.mxu0 %v508_v52  ;;  %v537_v50 = vld [vmem:[%s2845_s14 + $0x150] sm:$0xff]  ;;  %v612_v51 = vld [vmem:[%s2845_s14 + $0x3a8] sm:$0xff] }
 0x127   : > { %v540_v52 = vld [vmem:[%s2845_s14 + $0x168] sm:$0xff] }
 0x129   : > { %930 = vmatmul.mubr.f32.gmra.mrb[28].mxu1 %v579_v53  ;;  %750 = vmatmul.mubr.f32.gmra.mrb[14].mxu0 %v507_v54  ;;  %v611_v53 = vld [vmem:[%s2845_s14 + $0x3a0] sm:$0xff] }
 0x12a   : > { %934 = vmatprep.mubr.f32.mxu1 %v582_v55  ;;  %754 = vmatprep.mubr.f32.mxu0 %v510_v56  ;;  %v539_v54 = vld [vmem:[%s2845_s14 + $0x160] sm:$0xff]  ;;  %v614_v55 = vld [vmem:[%s2845_s14 + $0x3b8] sm:$0xff] }
 0x12b   : > { %v542_v56 = vld [vmem:[%s2845_s14 + $0x178] sm:$0xff] }
 0x12d   : > { %935 = vmatmul.mubr.f32.gmra.mrb[30].mxu1 %v581_v57  ;;  %755 = vmatmul.mubr.f32.gmra.mrb[16].mxu0 %v509_v58  ;;  %v613_v57 = vld [vmem:[%s2845_s14 + $0x3b0] sm:$0xff] }
 0x12e   : > { %939 = vmatprep.mubr.f32.mxu1 %v584_v59  ;;  %759 = vmatprep.mubr.f32.mxu0 %v512_v60  ;;  %v541_v58 = vld [vmem:[%s2845_s14 + $0x170] sm:$0xff]  ;;  %v616_v59 = vld [vmem:[%s2845_s14 + $0x3c8] sm:$0xff] }
 0x12f   : > { %v544_v60 = vld [vmem:[%s2845_s14 + $0x188] sm:$0xff] }
 0x131   : > { %940 = vmatmul.mubr.f32.gmra.mrb[32].mxu1 %v583_v61  ;;  %760 = vmatmul.mubr.f32.gmra.mrb[18].mxu0 %v511_v62  ;;  %v615_v61 = vld [vmem:[%s2845_s14 + $0x3c0] sm:$0xff] }
 0x132   : > { %944 = vmatprep.mubr.f32.mxu1 %v586_v63  ;;  %764 = vmatprep.mubr.f32.mxu0 %v514_v1  ;;  %v543_v62 = vld [vmem:[%s2845_s14 + $0x180] sm:$0xff]  ;;  %v618_v63 = vld [vmem:[%s2845_s14 + $0x3d8] sm:$0xff] }
 0x133   : > { %v546_v1 = vld [vmem:[%s2845_s14 + $0x198] sm:$0xff] }
 0x135   : > { %945 = vmatmul.mubr.f32.gmra.mrb[34].mxu1 %v585_v2  ;;  %765 = vmatmul.mubr.f32.gmra.mrb[20].mxu0 %v513_v3  ;;  %v617_v2 = vld [vmem:[%s2845_s14 + $0x3d0] sm:$0xff] }
 0x136   : > { %949 = vmatprep.mubr.f32.mxu1 %v588_v4  ;;  %769 = vmatprep.mubr.f32.mxu0 %v516_v5  ;;  %v545_v3 = vld [vmem:[%s2845_s14 + $0x190] sm:$0xff]  ;;  %v620_v4 = vld [vmem:[%s2845_s14 + $0x3e8] sm:$0xff] }
 0x137   : > { %v548_v5 = vld [vmem:[%s2845_s14 + $0x1a8] sm:$0xff] }
 0x139   : > { %950 = vmatmul.mubr.f32.gmra.mrb[36].mxu1 %v587_v6  ;;  %770 = vmatmul.mubr.f32.gmra.mrb[22].mxu0 %v515_v7  ;;  %v619_v6 = vld [vmem:[%s2845_s14 + $0x3e0] sm:$0xff] }
 0x13a   : > { %954 = vmatprep.mubr.f32.mxu1 %v590_v8  ;;  %774 = vmatprep.mubr.f32.mxu0 %v518_v9  ;;  %v547_v7 = vld [vmem:[%s2845_s14 + $0x1a0] sm:$0xff]  ;;  %v622_v8 = vld [vmem:[%s2845_s14 + $0x3f8] sm:$0xff] }
 0x13b   : > { %v550_v9 = vld [vmem:[%s2845_s14 + $0x1b8] sm:$0xff] }
 0x13d   : > { %955 = vmatmul.mubr.f32.gmra.mrb[38].mxu1 %v589_v10  ;;  %775 = vmatmul.mubr.f32.gmra.mrb[24].mxu0 %v517_v11  ;;  %v621_v10 = vld [vmem:[%s2845_s14 + $0x3f0] sm:$0xff] }
 0x13e   : > { %959 = vmatprep.mubr.f32.mxu1 %v592_v12  ;;  %779 = vmatprep.mubr.f32.mxu0 %v520_v13  ;;  %v549_v11 = vld [vmem:[%s2845_s14 + $0x1b0] sm:$0xff] }
 0x141   : > { %960 = vmatmul.mubr.f32.gmra.mrb[40].mxu1 %v591_v14  ;;  %780 = vmatmul.mubr.f32.gmra.mrb[26].mxu0 %v519_v15  ;;  %v1973_v14 = vld [vmem:[#allocation10] ss:$0 sm:$0xff] }
 0x142   : > { %964 = vmatprep.mubr.f32.mxu1 %v594_v16  ;;  %784 = vmatprep.mubr.f32.mxu0 %v522_v17 }
 0x145   : > { %965 = vmatmul.mubr.f32.gmra.mrb[42].mxu1 %v593_v18  ;;  %785 = vmatmul.mubr.f32.gmra.mrb[28].mxu0 %v521_v19 }
 0x146   : > { %969 = vmatprep.mubr.f32.mxu1 %v596_v20  ;;  %789 = vmatprep.mubr.f32.mxu0 %v524_v21 }
 0x149   : > { %970 = vmatmul.mubr.f32.gmra.mrb[44].mxu1 %v595_v22  ;;  %790 = vmatmul.mubr.f32.gmra.mrb[30].mxu0 %v523_v23 }
 0x14a   : > { %974 = vmatprep.mubr.f32.mxu1 %v598_v24  ;;  %794 = vmatprep.mubr.f32.mxu0 %v526_v25 }
 0x14d   : > { %975 = vmatmul.mubr.f32.gmra.mrb[46].mxu1 %v597_v26  ;;  %795 = vmatmul.mubr.f32.gmra.mrb[32].mxu0 %v525_v27  ;;  %v3064_v26 = vld [vmem:[#allocation11] ss:$0 sm:$0xff] }
 0x14e   : > { %979 = vmatprep.mubr.f32.mxu1 %v600_v28  ;;  %799 = vmatprep.mubr.f32.mxu0 %v528_v29 }
 0x151   : > { %980 = vmatmul.mubr.f32.gmra.mrb[48].mxu1 %v599_v30  ;;  %800 = vmatmul.mubr.f32.gmra.mrb[34].mxu0 %v527_v31 }
 0x152   : > { %984 = vmatprep.mubr.f32.mxu1 %v602_v32  ;;  %804 = vmatprep.mubr.f32.mxu0 %v530_v33 }
 0x155   : > { %985 = vmatmul.mubr.f32.gmra.mrb[50].mxu1 %v601_v34  ;;  %805 = vmatmul.mubr.f32.gmra.mrb[36].mxu0 %v529_v0 }
 0x156   : > { %989 = vmatprep.mubr.f32.mxu1 %v604_v35  ;;  %809 = vmatprep.mubr.f32.mxu0 %v532_v36 }
 0x159   : > { %990 = vmatmul.mubr.f32.gmra.mrb[52].mxu1 %v603_v37  ;;  %810 = vmatmul.mubr.f32.gmra.mrb[38].mxu0 %v531_v38 }
 0x15a   : > { %994 = vmatprep.mubr.f32.mxu1 %v606_v39  ;;  %814 = vmatprep.mubr.f32.mxu0 %v534_v40 }
 0x15d   : > { %995 = vmatmul.mubr.f32.gmra.mrb[54].mxu1 %v605_v41  ;;  %815 = vmatmul.mubr.f32.gmra.mrb[40].mxu0 %v533_v42 }
 0x15e   : > { %999 = vmatprep.mubr.f32.mxu1 %v608_v43  ;;  %819 = vmatprep.mubr.f32.mxu0 %v536_v44 }
 0x161   : > { %1000 = vmatmul.mubr.f32.gmra.mrb[56].mxu1 %v607_v45  ;;  %820 = vmatmul.mubr.f32.gmra.mrb[42].mxu0 %v535_v46 }
 0x162   : > { %1004 = vmatprep.mubr.f32.mxu1 %v610_v47  ;;  %824 = vmatprep.mubr.f32.mxu0 %v538_v48 }
 0x165   : > { %1005 = vmatmul.mubr.f32.gmra.mrb[58].mxu1 %v609_v49  ;;  %825 = vmatmul.mubr.f32.gmra.mrb[44].mxu0 %v537_v50 }
 0x166   : > { %1009 = vmatprep.mubr.f32.mxu1 %v612_v51  ;;  %829 = vmatprep.mubr.f32.mxu0 %v540_v52 }
 0x169   : > { %1010 = vmatmul.mubr.f32.gmra.mrb[60].mxu1 %v611_v53  ;;  %830 = vmatmul.mubr.f32.gmra.mrb[46].mxu0 %v539_v54 }
 0x16a   : > { %1014 = vmatprep.mubr.f32.mxu1 %v614_v55  ;;  %834 = vmatprep.mubr.f32.mxu0 %v542_v56 }
 0x16d   : > { %1015 = vmatmul.mubr.f32.gmra.mrb[62].mxu1 %v613_v57  ;;  %835 = vmatmul.mubr.f32.gmra.mrb[48].mxu0 %v541_v58 }
 0x16e   : > { %1019 = vmatprep.mubr.f32.mxu1 %v616_v59  ;;  %839 = vmatprep.mubr.f32.mxu0 %v544_v60 }
 0x171   : > { %1020 = vmatmul.mubr.f32.gmra.mrb[64].mxu1 %v615_v61  ;;  %840 = vmatmul.mubr.f32.gmra.mrb[50].mxu0 %v543_v62 }
 0x172   : > { %1024 = vmatprep.mubr.f32.mxu1 %v618_v63  ;;  %844 = vmatprep.mubr.f32.mxu0 %v546_v1 }
 0x175   : > { %1025 = vmatmul.mubr.f32.gmra.mrb[66].mxu1 %v617_v2  ;;  %845 = vmatmul.mubr.f32.gmra.mrb[52].mxu0 %v545_v3 }
 0x176   : > { %1029 = vmatprep.mubr.f32.mxu1 %v620_v4  ;;  %849 = vmatprep.mubr.f32.mxu0 %v548_v5 }
 0x179   : > { %1030 = vmatmul.mubr.f32.gmra.mrb[68].mxu1 %v619_v6  ;;  %850 = vmatmul.mubr.f32.gmra.mrb[54].mxu0 %v547_v7 }
 0x17a   : > { %1034 = vmatprep.mubr.f32.mxu1 %v622_v8  ;;  %854 = vmatprep.mubr.f32.mxu0 %v550_v9 }
 0x17d   : > { %1035 = vmatmul.mubr.f32.gmra.mrb[70].mxu1 %v621_v10  ;;  %855 = vmatmul.mubr.f32.gmra.mrb[56].mxu0 %v549_v11 }
 0x1a4   : > { %v2033_v12 = vpop.f32.mrb[0].mxu0 }
 0x1a5   : > { %v485_v13 = vpop.f32.mrb[1].mxu0  ;;  %v3060_v19 = vadd.f32 %v2033_v12, %v1973_v14 }
 0x1a6   : > { %v3057_v15 = vadd.f32 %v1973_v14, %v485_v13 }
 0x1c4   : > { %v861_v16 = vpop.f32.mrb[0].mxu1 }
 0x1c5   : > { %v1068_v17 = vadd.f32 %v861_v16, %v3057_v15  ;;  %v863_v18 = vpop.f32.mrb[1].mxu1 }
 0x1c7   : > { %2241 = vtanh.f32 %v1068_v17 }
 0x1c8   : > { %v866_v20 = vpop.f32.mrb[2].mxu1 }
 0x1c9   : > { %v1069_v21 = vadd.f32 %v866_v20, %v3060_v19  ;;  %v868_v22 = vpop.f32.mrb[3].mxu1 }
 0x1cb   : > { %2243 = vtanh.f32 %v1069_v21 }
 0x1cc   : > { %v871_v23 = vpop.f32.mrb[4].mxu1 }
 0x1cd   : > { %v1070_v24 = vadd.f32 %v871_v23, %v3057_v15  ;;  %v873_v25 = vpop.f32.mrb[5].mxu1 }
 0x1cf   : > { %2245 = vtanh.f32 %v1070_v24 }
 0x1d0   : > { %v876_v27 = vpop.f32.mrb[6].mxu1 }
 0x1d1   : > { %v2242_v28 = vpop.eup %2241  ;;  %v1071_v29 = vadd.f32 %v876_v27, %v3060_v19  ;;  %v878_v30 = vpop.f32.mrb[7].mxu1 }
 0x1d2   : > { %v1202_v31 = vmul.f32 %v2242_v28, %v3064_v26 }
 0x1d3   : > { %2247 = vtanh.f32 %v1071_v29 }
 0x1d4   : > { %v881_v32 = vpop.f32.mrb[8].mxu1  ;;  %1294 = vadd.xlane.f32.xlu0 %v1202_v31 }
 0x1d5   : > { %v2244_v33 = vpop.eup %2243  ;;  %v1072_v34 = vadd.f32 %v881_v32, %v3057_v15  ;;  %v883_v0 = vpop.f32.mrb[9].mxu1 }
 0x1d6   : > { %v1203_v35 = vmul.f32 %v2244_v33, %v3064_v26 }
 0x1d7   : > { %2249 = vtanh.f32 %v1072_v34 }
 0x1d8   : > { %v886_v36 = vpop.f32.mrb[10].mxu1  ;;  %1296 = vadd.xlane.f32.xlu1 %v1203_v35 }
 0x1d9   : > { %v2246_v37 = vpop.eup %2245  ;;  %v1073_v38 = vadd.f32 %v886_v36, %v3060_v19  ;;  %v888_v39 = vpop.f32.mrb[11].mxu1 }
 0x1da   : > { %v1204_v40 = vmul.f32 %v2246_v37, %v3064_v26 }
 0x1db   : > { %2251 = vtanh.f32 %v1073_v38 }
 0x1dc   : > { %v891_v41 = vpop.f32.mrb[12].mxu1  ;;  %1298 = vadd.xlane.f32.xlu0 %v1204_v40 }
 0x1dd   : > { %v2248_v42 = vpop.eup %2247  ;;  %v1074_v43 = vadd.f32 %v891_v41, %v3057_v15  ;;  %v893_v44 = vpop.f32.mrb[13].mxu1 }
 0x1de   : > { %v1205_v45 = vmul.f32 %v2248_v42, %v3064_v26 }
 0x1df   : > { %2253 = vtanh.f32 %v1074_v43 }
 0x1e0   : > { %v896_v46 = vpop.f32.mrb[14].mxu1  ;;  %1300 = vadd.xlane.f32.xlu1 %v1205_v45 }
 0x1e1   : > { %v2250_v47 = vpop.eup %2249  ;;  %v1075_v48 = vadd.f32 %v896_v46, %v3060_v19  ;;  %v898_v49 = vpop.f32.mrb[15].mxu1 }
 0x1e2   : > { %v1206_v50 = vmul.f32 %v2250_v47, %v3064_v26 }
 0x1e3   : > { %2255 = vtanh.f32 %v1075_v48 }
 0x1e4   : > { %v901_v51 = vpop.f32.mrb[16].mxu1  ;;  %1302 = vadd.xlane.f32.xlu0 %v1206_v50  ;;  %v721_v52 = vpop.f32.mrb[2].mxu0 }
 0x1e5   : > { %v2252_v53 = vpop.eup %2251  ;;  %v1076_v54 = vadd.f32 %v901_v51, %v3057_v15  ;;  %v1040_v55 = vadd.f32 %v721_v52, %v3057_v15  ;;  %v903_v56 = vpop.f32.mrb[17].mxu1 }
 0x1e6   : > { %v723_v57 = vpop.f32.mrb[3].mxu0  ;;  %v1207_v58 = vmul.f32 %v2252_v53, %v3064_v26 }
 0x1e7   : > { %2257 = vtanh.f32 %v1076_v54 }
 0x1e8   : > { %v906_v59 = vpop.f32.mrb[18].mxu1  ;;  %1304 = vadd.xlane.f32.xlu1 %v1207_v58  ;;  %v726_v60 = vpop.f32.mrb[4].mxu0  ;;  %2259 = vtanh.f32 %v1040_v55 }
 0x1e9   : > { %v2254_v61 = vpop.eup %2253  ;;  %v1077_v62 = vadd.f32 %v906_v59, %v3060_v19  ;;  %v1041_v63 = vadd.f32 %v726_v60, %v3060_v19  ;;  %v908_v1 = vpop.f32.mrb[19].mxu1 }
 0x1ea   : > { %v728_v2 = vpop.f32.mrb[5].mxu0  ;;  %v1208_v3 = vmul.f32 %v2254_v61, %v3064_v26 }
 0x1eb   : > { %2261 = vtanh.f32 %v1077_v62 }
 0x1ec   : > { %v911_v4 = vpop.f32.mrb[20].mxu1  ;;  %1306 = vadd.xlane.f32.xlu0 %v1208_v3  ;;  %v731_v5 = vpop.f32.mrb[6].mxu0  ;;  %2263 = vtanh.f32 %v1041_v63 }
 0x1ed   : > { %v2256_v6 = vpop.eup %2255  ;;  %v1078_v7 = vadd.f32 %v911_v4, %v3057_v15  ;;  %v1042_v8 = vadd.f32 %v731_v5, %v3057_v15  ;;  %v913_v9 = vpop.f32.mrb[21].mxu1 }
 0x1ee   : > { %v733_v10 = vpop.f32.mrb[7].mxu0  ;;  %v1209_v11 = vmul.f32 %v2256_v6, %v3064_v26 }
 0x1ef   : > { %2265 = vtanh.f32 %v1042_v8 }
 0x1f0   : > { %v916_v12 = vpop.f32.mrb[22].mxu1  ;;  %1308 = vadd.xlane.f32.xlu1 %v1209_v11  ;;  %v736_v13 = vpop.f32.mrb[8].mxu0  ;;  %2267 = vtanh.f32 %v1078_v7 }
 0x1f1   : > { %v2258_v14 = vpop.eup %2257  ;;  %v1079_v16 = vadd.f32 %v916_v12, %v3060_v19  ;;  %v918_v17 = vpop.f32.mrb[23].mxu1  ;;  %v1043_v20 = vadd.f32 %v736_v13, %v3060_v19 }
 0x1f2   : > { %v738_v18 = vpop.f32.mrb[9].mxu0  ;;  %v1210_v21 = vmul.f32 %v2258_v14, %v3064_v26  ;;  %v2260_v22 = vpop.eup %2259 }
 0x1f3   : > { %2269 = vtanh.f32 %v1079_v16  ;;  %v1174_v32 = vmul.f32 %v2260_v22, %v3064_v26 }
 0x1f4   : > { %v921_v23 = vpop.f32.mrb[24].mxu1  ;;  %1310 = vadd.xlane.f32.xlu0 %v1210_v21  ;;  %v741_v24 = vpop.f32.mrb[10].mxu0  ;;  %2271 = vtanh.f32 %v1043_v20 }
 0x1f5   : > { %v2262_v25 = vpop.eup %2261  ;;  %v1080_v27 = vadd.f32 %v921_v23, %v3057_v15  ;;  %v1044_v28 = vadd.f32 %v741_v24, %v3057_v15  ;;  %v923_v29 = vpop.f32.mrb[25].mxu1 }
 0x1f6   : > { %v743_v30 = vpop.f32.mrb[11].mxu0  ;;  %v1211_v31 = vmul.f32 %v2262_v25, %v3064_v26  ;;  %v2264_v33 = vpop.eup %2263 }
 0x1f7   : > { %2273 = vtanh.f32 %v1080_v27  ;;  %v1175_v40 = vmul.f32 %v2264_v33, %v3064_v26 }
 0x1f8   : > { %v926_v34 = vpop.f32.mrb[26].mxu1  ;;  %1312 = vadd.xlane.f32.xlu1 %v1211_v31  ;;  %1238 = vadd.xlane.f32.xlu0 %v1174_v32  ;;  %v746_v0 = vpop.f32.mrb[12].mxu0  ;;  %2275 = vtanh.f32 %v1044_v28 }
 0x1f9   : > { %v1081_v35 = vadd.f32 %v926_v34, %v3060_v19  ;;  %v928_v36 = vpop.f32.mrb[27].mxu1  ;;  %v748_v37 = vpop.f32.mrb[13].mxu0  ;;  %v1045_v39 = vadd.f32 %v746_v0, %v3060_v19 }
 0x1fa   : > { %v2266_v38 = vpop.eup %2265 }
 0x1fb   : > { %v2268_v41 = vpop.eup %2267  ;;  %2277 = vtanh.f32 %v1081_v35  ;;  %v1176_v42 = vmul.f32 %v2266_v38, %v3064_v26 }
 0x1fc   : > { %v931_v43 = vpop.f32.mrb[28].mxu1  ;;  %1240 = vadd.xlane.f32.xlu0 %v1175_v40  ;;  %v751_v44 = vpop.f32.mrb[14].mxu0  ;;  %2279 = vtanh.f32 %v1045_v39  ;;  %v1212_v50 = vmul.f32 %v2268_v41, %v3064_v26 }
 0x1fd   : > { %v2270_v45 = vpop.eup %2269  ;;  %v1082_v46 = vadd.f32 %v931_v43, %v3057_v15  ;;  %v1046_v47 = vadd.f32 %v751_v44, %v3057_v15  ;;  %v933_v48 = vpop.f32.mrb[29].mxu1  ;;  %1242 = vadd.xlane.f32.xlu1 %v1176_v42 }
 0x1fe   : > { %v753_v49 = vpop.f32.mrb[15].mxu0  ;;  %v1213_v51 = vmul.f32 %v2270_v45, %v3064_v26  ;;  %v2272_v52 = vpop.eup %2271 }
 0x1ff   : > { %2281 = vtanh.f32 %v1082_v46  ;;  %v1177_v62 = vmul.f32 %v2272_v52, %v3064_v26 }
 0x200   : > { %v936_v53 = vpop.f32.mrb[30].mxu1  ;;  %1314 = vadd.xlane.f32.xlu0 %v1212_v50  ;;  %v756_v54 = vpop.f32.mrb[16].mxu0  ;;  %2283 = vtanh.f32 %v1046_v47 }
 0x201   : > { %v2274_v55 = vpop.eup %2273  ;;  %v1083_v56 = vadd.f32 %v936_v53, %v3060_v19  ;;  %v938_v57 = vpop.f32.mrb[31].mxu1  ;;  %1316 = vadd.xlane.f32.xlu1 %v1213_v51  ;;  %v1047_v59 = vadd.f32 %v756_v54, %v3060_v19 }
 0x202   : > { %v758_v58 = vpop.f32.mrb[17].mxu0  ;;  %v1214_v60 = vmul.f32 %v2274_v55, %v3064_v26  ;;  %v2276_v61 = vpop.eup %2275 }
 0x203   : > { %2285 = vtanh.f32 %v1083_v56  ;;  %v1178_v7 = vmul.f32 %v2276_v61, %v3064_v26 }
 0x204   : > { %v941_v63 = vpop.f32.mrb[32].mxu1  ;;  %1318 = vadd.xlane.f32.xlu0 %v1214_v60  ;;  %v761_v1 = vpop.f32.mrb[18].mxu0  ;;  %2287 = vtanh.f32 %v1047_v59 }
 0x205   : > { %v2278_v2 = vpop.eup %2277  ;;  %v1084_v3 = vadd.f32 %v941_v63, %v3057_v15  ;;  %v1048_v4 = vadd.f32 %v761_v1, %v3057_v15  ;;  %v943_v5 = vpop.f32.mrb[33].mxu1  ;;  %1244 = vadd.xlane.f32.xlu1 %v1177_v62 }
 0x206   : > { %v763_v6 = vpop.f32.mrb[19].mxu0  ;;  %v1215_v8 = vmul.f32 %v2278_v2, %v3064_v26  ;;  %v2280_v9 = vpop.eup %2279 }
 0x207   : > { %2289 = vtanh.f32 %v1084_v3  ;;  %v1179_v21 = vmul.f32 %v2280_v9, %v3064_v26 }
 0x208   : > { %v946_v10 = vpop.f32.mrb[34].mxu1  ;;  %1246 = vadd.xlane.f32.xlu0 %v1178_v7  ;;  %v766_v11 = vpop.f32.mrb[20].mxu0  ;;  %2291 = vtanh.f32 %v1048_v4 }
 0x209   : > { %v2282_v12 = vpop.eup %2281  ;;  %v1085_v13 = vadd.f32 %v946_v10, %v3060_v19  ;;  %v948_v14 = vpop.f32.mrb[35].mxu1  ;;  %1320 = vadd.xlane.f32.xlu1 %v1215_v8  ;;  %v1049_v17 = vadd.f32 %v766_v11, %v3060_v19 }
 0x20a   : > { %v768_v16 = vpop.f32.mrb[21].mxu0  ;;  %v1216_v18 = vmul.f32 %v2282_v12, %v3064_v26  ;;  %v2284_v20 = vpop.eup %2283 }
 0x20b   : > { %2293 = vtanh.f32 %v1085_v13  ;;  %v1180_v30 = vmul.f32 %v2284_v20, %v3064_v26 }
 0x20c   : > { %v951_v22 = vpop.f32.mrb[36].mxu1  ;;  %1322 = vadd.xlane.f32.xlu0 %v1216_v18  ;;  %v771_v23 = vpop.f32.mrb[22].mxu0  ;;  %2295 = vtanh.f32 %v1049_v17 }
 0x20d   : > { %v2286_v24 = vpop.eup %2285  ;;  %v1086_v25 = vadd.f32 %v951_v22, %v3057_v15  ;;  %v1050_v27 = vadd.f32 %v771_v23, %v3057_v15  ;;  %v953_v28 = vpop.f32.mrb[37].mxu1  ;;  %1248 = vadd.xlane.f32.xlu1 %v1179_v21 }
 0x20e   : > { %v773_v29 = vpop.f32.mrb[23].mxu0  ;;  %v1217_v31 = vmul.f32 %v2286_v24, %v3064_v26  ;;  %v2288_v32 = vpop.eup %2287 }
 0x20f   : > { %2297 = vtanh.f32 %v1086_v25  ;;  %v1181_v41 = vmul.f32 %v2288_v32, %v3064_v26 }
 0x210   : > { %v956_v33 = vpop.f32.mrb[38].mxu1  ;;  %1250 = vadd.xlane.f32.xlu0 %v1180_v30  ;;  %v776_v34 = vpop.f32.mrb[24].mxu0  ;;  %2299 = vtanh.f32 %v1050_v27 }
 0x211   : > { %v2290_v0 = vpop.eup %2289  ;;  %v1087_v35 = vadd.f32 %v956_v33, %v3060_v19  ;;  %v958_v36 = vpop.f32.mrb[39].mxu1  ;;  %1324 = vadd.xlane.f32.xlu1 %v1217_v31  ;;  %v1051_v38 = vadd.f32 %v776_v34, %v3060_v19 }
 0x212   : > { %v778_v37 = vpop.f32.mrb[25].mxu0  ;;  %v1218_v39 = vmul.f32 %v2290_v0, %v3064_v26  ;;  %v2292_v40 = vpop.eup %2291 }
 0x213   : > { %2301 = vtanh.f32 %v1087_v35  ;;  %v1182_v49 = vmul.f32 %v2292_v40, %v3064_v26 }
 0x214   : > { %v961_v42 = vpop.f32.mrb[40].mxu1  ;;  %1326 = vadd.xlane.f32.xlu0 %v1218_v39  ;;  %v781_v43 = vpop.f32.mrb[26].mxu0  ;;  %2303 = vtanh.f32 %v1051_v38 }
 0x215   : > { %v2294_v44 = vpop.eup %2293  ;;  %v1088_v45 = vadd.f32 %v961_v42, %v3057_v15  ;;  %v1052_v46 = vadd.f32 %v781_v43, %v3057_v15  ;;  %v963_v47 = vpop.f32.mrb[41].mxu1  ;;  %1252 = vadd.xlane.f32.xlu1 %v1181_v41 }
 0x216   : > { %v783_v48 = vpop.f32.mrb[27].mxu0  ;;  %v1219_v50 = vmul.f32 %v2294_v44, %v3064_v26  ;;  %v2296_v51 = vpop.eup %2295 }
 0x217   : > { %2305 = vtanh.f32 %v1088_v45  ;;  %v1183_v61 = vmul.f32 %v2296_v51, %v3064_v26 }
 0x218   : > { %v966_v52 = vpop.f32.mrb[42].mxu1  ;;  %1254 = vadd.xlane.f32.xlu0 %v1182_v49  ;;  %v786_v53 = vpop.f32.mrb[28].mxu0  ;;  %2307 = vtanh.f32 %v1052_v46 }
 0x219   : > { %v2298_v54 = vpop.eup %2297  ;;  %v1089_v55 = vadd.f32 %v966_v52, %v3060_v19  ;;  %v968_v56 = vpop.f32.mrb[43].mxu1  ;;  %1328 = vadd.xlane.f32.xlu1 %v1219_v50  ;;  %v1053_v58 = vadd.f32 %v786_v53, %v3060_v19 }
 0x21a   : > { %v788_v57 = vpop.f32.mrb[29].mxu0  ;;  %v1220_v59 = vmul.f32 %v2298_v54, %v3064_v26  ;;  %v2300_v60 = vpop.eup %2299 }
 0x21b   : > { %2309 = vtanh.f32 %v1089_v55  ;;  %v1184_v6 = vmul.f32 %v2300_v60, %v3064_v26 }
 0x21c   : > { %v971_v62 = vpop.f32.mrb[44].mxu1  ;;  %1330 = vadd.xlane.f32.xlu0 %v1220_v59  ;;  %v791_v63 = vpop.f32.mrb[30].mxu0  ;;  %2311 = vtanh.f32 %v1053_v58 }
 0x21d   : > { %v2302_v1 = vpop.eup %2301  ;;  %v1090_v2 = vadd.f32 %v971_v62, %v3057_v15  ;;  %v1054_v3 = vadd.f32 %v791_v63, %v3057_v15  ;;  %v973_v4 = vpop.f32.mrb[45].mxu1  ;;  %1256 = vadd.xlane.f32.xlu1 %v1183_v61 }
 0x21e   : > { %v793_v5 = vpop.f32.mrb[31].mxu0  ;;  %v1221_v7 = vmul.f32 %v2302_v1, %v3064_v26  ;;  %v2304_v8 = vpop.eup %2303 }
 0x21f   : > { %2313 = vtanh.f32 %v1090_v2  ;;  %v1185_v20 = vmul.f32 %v2304_v8, %v3064_v26 }
 0x220   : > { %v976_v9 = vpop.f32.mrb[46].mxu1  ;;  %1258 = vadd.xlane.f32.xlu0 %v1184_v6  ;;  %v796_v10 = vpop.f32.mrb[32].mxu0  ;;  %2315 = vtanh.f32 %v1054_v3 }
 0x221   : > { %v2306_v11 = vpop.eup %2305  ;;  %v1091_v12 = vadd.f32 %v976_v9, %v3060_v19  ;;  %v978_v13 = vpop.f32.mrb[47].mxu1  ;;  %1332 = vadd.xlane.f32.xlu1 %v1221_v7  ;;  %v1055_v16 = vadd.f32 %v796_v10, %v3060_v19 }
 0x222   : > { %v798_v14 = vpop.f32.mrb[33].mxu0  ;;  %v1222_v17 = vmul.f32 %v2306_v11, %v3064_v26  ;;  %v2308_v18 = vpop.eup %2307 }
 0x223   : > { %2317 = vtanh.f32 %v1091_v12  ;;  %v1186_v29 = vmul.f32 %v2308_v18, %v3064_v26 }
 0x224   : > { %v981_v21 = vpop.f32.mrb[48].mxu1  ;;  %1334 = vadd.xlane.f32.xlu0 %v1222_v17  ;;  %v801_v22 = vpop.f32.mrb[34].mxu0  ;;  %2319 = vtanh.f32 %v1055_v16 }
 0x225   : > { %v2310_v23 = vpop.eup %2309  ;;  %v1092_v24 = vadd.f32 %v981_v21, %v3057_v15  ;;  %v1056_v25 = vadd.f32 %v801_v22, %v3057_v15  ;;  %v983_v27 = vpop.f32.mrb[49].mxu1  ;;  %1260 = vadd.xlane.f32.xlu1 %v1185_v20 }
 0x226   : > { %v803_v28 = vpop.f32.mrb[35].mxu0  ;;  %v1223_v30 = vmul.f32 %v2310_v23, %v3064_v26  ;;  %v2312_v31 = vpop.eup %2311 }
 0x227   : > { %2321 = vtanh.f32 %v1092_v24  ;;  %v1187_v40 = vmul.f32 %v2312_v31, %v3064_v26 }
 0x228   : > { %v986_v32 = vpop.f32.mrb[50].mxu1  ;;  %1262 = vadd.xlane.f32.xlu0 %v1186_v29  ;;  %v806_v33 = vpop.f32.mrb[36].mxu0  ;;  %2323 = vtanh.f32 %v1056_v25 }
 0x229   : > { %v2314_v34 = vpop.eup %2313  ;;  %v1093_v0 = vadd.f32 %v986_v32, %v3060_v19  ;;  %v988_v35 = vpop.f32.mrb[51].mxu1  ;;  %1336 = vadd.xlane.f32.xlu1 %v1223_v30  ;;  %v1057_v37 = vadd.f32 %v806_v33, %v3060_v19 }
 0x22a   : > { %v808_v36 = vpop.f32.mrb[37].mxu0  ;;  %v1224_v38 = vmul.f32 %v2314_v34, %v3064_v26  ;;  %v2316_v39 = vpop.eup %2315 }
 0x22b   : > { %2325 = vtanh.f32 %v1093_v0  ;;  %v1188_v48 = vmul.f32 %v2316_v39, %v3064_v26 }
 0x22c   : > { %v991_v41 = vpop.f32.mrb[52].mxu1  ;;  %1338 = vadd.xlane.f32.xlu0 %v1224_v38  ;;  %v811_v42 = vpop.f32.mrb[38].mxu0  ;;  %2327 = vtanh.f32 %v1057_v37 }
 0x22d   : > { %v2318_v43 = vpop.eup %2317  ;;  %v1094_v44 = vadd.f32 %v991_v41, %v3057_v15  ;;  %v1058_v45 = vadd.f32 %v811_v42, %v3057_v15  ;;  %v993_v46 = vpop.f32.mrb[53].mxu1  ;;  %1264 = vadd.xlane.f32.xlu1 %v1187_v40 }
 0x22e   : > { %v813_v47 = vpop.f32.mrb[39].mxu0  ;;  %v1225_v49 = vmul.f32 %v2318_v43, %v3064_v26  ;;  %v2320_v50 = vpop.eup %2319 }
 0x22f   : > { %2329 = vtanh.f32 %v1094_v44  ;;  %v1189_v60 = vmul.f32 %v2320_v50, %v3064_v26 }
 0x230   : > { %v996_v51 = vpop.f32.mrb[54].mxu1  ;;  %1266 = vadd.xlane.f32.xlu0 %v1188_v48  ;;  %v816_v52 = vpop.f32.mrb[40].mxu0  ;;  %2331 = vtanh.f32 %v1058_v45 }
 0x231   : > { %v2322_v53 = vpop.eup %2321  ;;  %v1095_v54 = vadd.f32 %v996_v51, %v3060_v19  ;;  %v998_v55 = vpop.f32.mrb[55].mxu1  ;;  %1340 = vadd.xlane.f32.xlu1 %v1225_v49  ;;  %v1059_v57 = vadd.f32 %v816_v52, %v3060_v19 }
 0x232   : > { %v818_v56 = vpop.f32.mrb[41].mxu0  ;;  %v1226_v58 = vmul.f32 %v2322_v53, %v3064_v26  ;;  %v2324_v59 = vpop.eup %2323 }
 0x233   : > { %2333 = vtanh.f32 %v1095_v54  ;;  %v1190_v5 = vmul.f32 %v2324_v59, %v3064_v26 }
 0x234   : > { %v1001_v61 = vpop.f32.mrb[56].mxu1  ;;  %1342 = vadd.xlane.f32.xlu0 %v1226_v58  ;;  %v821_v62 = vpop.f32.mrb[42].mxu0  ;;  %2335 = vtanh.f32 %v1059_v57 }
 0x235   : > { %v2326_v63 = vpop.eup %2325  ;;  %v1096_v1 = vadd.f32 %v1001_v61, %v3057_v15  ;;  %v1060_v2 = vadd.f32 %v821_v62, %v3057_v15  ;;  %v1003_v3 = vpop.f32.mrb[57].mxu1  ;;  %1268 = vadd.xlane.f32.xlu1 %v1189_v60 }
 0x236   : > { %v823_v4 = vpop.f32.mrb[43].mxu0  ;;  %v1227_v6 = vmul.f32 %v2326_v63, %v3064_v26  ;;  %v2328_v7 = vpop.eup %2327 }
 0x237   : > { %2337 = vtanh.f32 %v1096_v1  ;;  %v1191_v18 = vmul.f32 %v2328_v7, %v3064_v26 }
 0x238   : > { %v1006_v8 = vpop.f32.mrb[58].mxu1  ;;  %1270 = vadd.xlane.f32.xlu0 %v1190_v5  ;;  %v826_v9 = vpop.f32.mrb[44].mxu0  ;;  %2339 = vtanh.f32 %v1060_v2 }
 0x239   : > { %v2330_v10 = vpop.eup %2329  ;;  %v1097_v11 = vadd.f32 %v1006_v8, %v3060_v19  ;;  %v1008_v12 = vpop.f32.mrb[59].mxu1  ;;  %1344 = vadd.xlane.f32.xlu1 %v1227_v6  ;;  %v1061_v14 = vadd.f32 %v826_v9, %v3060_v19 }
 0x23a   : > { %v828_v13 = vpop.f32.mrb[45].mxu0  ;;  %v1228_v16 = vmul.f32 %v2330_v10, %v3064_v26  ;;  %v2332_v17 = vpop.eup %2331 }
 0x23b   : > { %2341 = vtanh.f32 %v1097_v11  ;;  %v1192_v28 = vmul.f32 %v2332_v17, %v3064_v26 }
 0x23c   : > { %v1011_v20 = vpop.f32.mrb[60].mxu1  ;;  %1346 = vadd.xlane.f32.xlu0 %v1228_v16  ;;  %v831_v21 = vpop.f32.mrb[46].mxu0  ;;  %2343 = vtanh.f32 %v1061_v14 }
 0x23d   : > { %v2334_v22 = vpop.eup %2333  ;;  %v1098_v23 = vadd.f32 %v1011_v20, %v3057_v15  ;;  %v1062_v24 = vadd.f32 %v831_v21, %v3057_v15  ;;  %v1013_v25 = vpop.f32.mrb[61].mxu1  ;;  %1272 = vadd.xlane.f32.xlu1 %v1191_v18 }
 0x23e   : > { %v833_v27 = vpop.f32.mrb[47].mxu0  ;;  %v1229_v29 = vmul.f32 %v2334_v22, %v3064_v26  ;;  %v2336_v30 = vpop.eup %2335  ;;  %v1430_v22 = vlaneseq }
 0x23f   : > { %2345 = vtanh.f32 %v1098_v23  ;;  %v1193_v39 = vmul.f32 %v2336_v30, %v3064_v26 }
 0x240   : > { %v1016_v31 = vpop.f32.mrb[62].mxu1  ;;  %1274 = vadd.xlane.f32.xlu0 %v1192_v28  ;;  %v836_v32 = vpop.f32.mrb[48].mxu0  ;;  %2347 = vtanh.f32 %v1062_v24  ;;  %v1431_v27 = vand.u32 127, %v1430_v22 }
 0x241   : > { %v2338_v33 = vpop.eup %2337  ;;  %v1099_v34 = vadd.f32 %v1016_v31, %v3060_v19  ;;  %v1018_v0 = vpop.f32.mrb[63].mxu1  ;;  %1348 = vadd.xlane.f32.xlu1 %v1229_v29  ;;  %v1063_v36 = vadd.f32 %v836_v32, %v3060_v19  ;;  %v1433_v29 = vshrl.u32 %v1430_v22, 7 }
 0x242   : > { %v838_v35 = vpop.f32.mrb[49].mxu0  ;;  %v1230_v37 = vmul.f32 %v2338_v33, %v3064_v26  ;;  %v2340_v38 = vpop.eup %2339  ;;  %v1436_v30 = vadd.s32 4294967288, %v1431_v27 }
 0x243   : > { %2349 = vtanh.f32 %v1099_v34  ;;  %v1194_v47 = vmul.f32 %v2340_v38, %v3064_v26  ;;  %v3190_v34 = vsub.s32 %v1431_v27, %v1433_v29 }
 0x244   : > { %v1021_v40 = vpop.f32.mrb[64].mxu1  ;;  %1350 = vadd.xlane.f32.xlu0 %v1230_v37  ;;  %v841_v41 = vpop.f32.mrb[50].mxu0  ;;  %2351 = vtanh.f32 %v1063_v36  ;;  %v3192_v0 = vsub.s32 %v1436_v30, %v1433_v29 }
 0x245   : > { %v2342_v42 = vpop.eup %2341  ;;  %v1100_v43 = vadd.f32 %v1021_v40, %v3057_v15  ;;  %v1064_v44 = vadd.f32 %v841_v41, %v3057_v15  ;;  %v1023_v45 = vpop.f32.mrb[65].mxu1  ;;  %1276 = vadd.xlane.f32.xlu1 %v1193_v39 }
 0x246   : > { %v843_v46 = vpop.f32.mrb[51].mxu0  ;;  %v1231_v48 = vmul.f32 %v2342_v42, %v3064_v26  ;;  %v2344_v49 = vpop.eup %2343 }
 0x247   : > { %2353 = vtanh.f32 %v1100_v43  ;;  %v1195_v59 = vmul.f32 %v2344_v49, %v3064_v26 }
 0x248   : > { %v1026_v50 = vpop.f32.mrb[66].mxu1  ;;  %1278 = vadd.xlane.f32.xlu0 %v1194_v47  ;;  %v846_v51 = vpop.f32.mrb[52].mxu0  ;;  %2355 = vtanh.f32 %v1064_v44 }
 0x249   : > { %v2346_v52 = vpop.eup %2345  ;;  %v1101_v53 = vadd.f32 %v1026_v50, %v3060_v19  ;;  %v1028_v54 = vpop.f32.mrb[67].mxu1  ;;  %1352 = vadd.xlane.f32.xlu1 %v1231_v48  ;;  %v1065_v56 = vadd.f32 %v846_v51, %v3060_v19 }
 0x24a   : > { %v848_v55 = vpop.f32.mrb[53].mxu0  ;;  %v1232_v57 = vmul.f32 %v2346_v52, %v3064_v26  ;;  %v2348_v58 = vpop.eup %2347 }
 0x24b   : > { %2357 = vtanh.f32 %v1101_v53  ;;  %v1196_v4 = vmul.f32 %v2348_v58, %v3064_v26 }
 0x24c   : > { %v1031_v60 = vpop.f32.mrb[68].mxu1  ;;  %1354 = vadd.xlane.f32.xlu0 %v1232_v57  ;;  %v851_v61 = vpop.f32.mrb[54].mxu0  ;;  %2359 = vtanh.f32 %v1065_v56 }
 0x24d   : > { %v2350_v62 = vpop.eup %2349  ;;  %v1066_v63 = vadd.f32 %v851_v61, %v3057_v15  ;;  %1280 = vadd.xlane.f32.xlu1 %v1195_v59  ;;  %v853_v1 = vpop.f32.mrb[55].mxu0  ;;  %v1102_v3 = vadd.f32 %v1031_v60, %v3057_v15 }
 0x24e   : > { %v1033_v2 = vpop.f32.mrb[69].mxu1  ;;  %v1233_v5 = vmul.f32 %v2350_v62, %v3064_v26  ;;  %v2352_v6 = vpop.eup %2351 }
 0x24f   : > { %2361 = vtanh.f32 %v1066_v63  ;;  %v1197_v16 = vmul.f32 %v2352_v6, %v3064_v26 }
 0x250   : > { %v1036_v7 = vpop.f32.mrb[70].mxu1  ;;  %1282 = vadd.xlane.f32.xlu0 %v1196_v4  ;;  %v856_v8 = vpop.f32.mrb[56].mxu0  ;;  %2363 = vtanh.f32 %v1102_v3 }
 0x251   : > { %v2354_v9 = vpop.eup %2353  ;;  %v1067_v10 = vadd.f32 %v856_v8, %v3060_v19  ;;  %1356 = vadd.xlane.f32.xlu1 %v1233_v5  ;;  %v858_v11 = vpop.f32.mrb[57].mxu0  ;;  %v1103_v13 = vadd.f32 %v1036_v7, %v3060_v19 }
 0x252   : > { %v1038_v12 = vpop.f32.mrb[71].mxu1  ;;  %v1234_v15 = vmul.f32 %v2354_v9, %v3064_v26  ;;  %v2356_v14 = vpop.eup %2355 }
 0x253   : > { %2365 = vtanh.f32 %v1067_v10  ;;  %v1198_v18 = vmul.f32 %v2356_v14, %v3064_v26 }
 0x254   : > { %1358 = vadd.xlane.f32.xlu0 %v1234_v15  ;;  %2367 = vtanh.f32 %v1103_v13 }
 0x255   : > { %v2358_v17 = vpop.eup %2357  ;;  %1284 = vadd.xlane.f32.xlu1 %v1197_v16 }
 0x256   : > { %v1235_v20 = vmul.f32 %v2358_v17, %v3064_v26  ;;  %v2360_v21 = vpop.eup %2359 }
 0x257   : > { %v1199_v19 = vmul.f32 %v2360_v21, %v3064_v26 }
 0x258   : > { %1286 = vadd.xlane.f32.xlu0 %v1198_v18 }
 0x259   : > { %1360 = vadd.xlane.f32.xlu1 %v1235_v20  ;;  %v2362_v23 = vpop.eup %2361 }
 0x25a   : > { %v1200_v24 = vmul.f32 %v2362_v23, %v3064_v26  ;;  %v2364_v25 = vpop.eup %2363 }
 0x25b   : > { %v1236_v32 = vmul.f32 %v2364_v25, %v3064_v26 }
 0x25c   : > { %1290 = vadd.xlane.f32.xlu0 %v1200_v24 }
 0x25d   : > { %1288 = vadd.xlane.f32.xlu1 %v1199_v19  ;;  %v2366_v28 = vpop.eup %2365 }
 0x25e   : > { %v1201_v31 = vmul.f32 %v2366_v28, %v3064_v26  ;;  %v2368_v33 = vpop.eup %2367 }
 0x25f   : > { %v1237_v36 = vmul.f32 %v2368_v33, %v3064_v26 }
 0x260   : > { %1362 = vadd.xlane.f32.xlu0 %v1236_v32 }
 0x261   : > { %1292 = vadd.xlane.f32.xlu1 %v1201_v31  ;;  %v1295_v35 = vpop.xlane.xlu0 %1294 }
 0x262   : > { %v1563_v38 = vrot.slane %v1295_v35, %v3190_v34 }
 0x265   : > { %v1297_v37 = vpop.xlane.xlu1 %1296  ;;  %1364 = vadd.xlane.f32.xlu1 %v1237_v36 }
 0x266   : > { %v1567_v39 = vrot.slane %v1297_v37, %v3192_v0 }
 0x268   : > { %v3198_v40 = vsel %vm1441_vm0, %v1567_v39, %v1563_v38 }
 0x269   : > { %v1299_v41 = vpop.xlane.xlu0 %1298 }
 0x26a   : > { %v1572_v43 = vrot.slane %v1299_v41, %v3190_v34 }
 0x26d   : > { %v1301_v42 = vpop.xlane.xlu1 %1300 }
 0x26e   : > { %v1576_v44 = vrot.slane %v1301_v42, %v3192_v0 }
 0x270   : > { %v3203_v45 = vsel %vm1441_vm0, %v1576_v44, %v1572_v43 }
 0x271   : > { %v1303_v26 = vpop.xlane.xlu0 %1302 }
 0x272   : > { %v1581_v13 = vrot.slane %v1303_v26, %v3190_v34 }
 0x275   : > { %v1305_v46 = vpop.xlane.xlu1 %1304 }
 0x276   : > { %v1585_v7 = vrot.slane %v1305_v46, %v3192_v0 }
 0x278   : > { %v1586_v22 = vsel %vm1441_vm0, %v1585_v7, %v1581_v13 }
 0x279   : > { %v1307_v47 = vpop.xlane.xlu0 %1306 }
 0x27a   : > { %v1590_v8 = vrot.slane %v1307_v47, %v3190_v34 }
 0x27d   : > { %v1309_v48 = vpop.xlane.xlu1 %1308 }
 0x27e   : > { %v1594_v3 = vrot.slane %v1309_v48, %v3192_v0 }
 0x280   : > { %v1595_v15 = vsel %vm1441_vm0, %v1594_v3, %v1590_v8 }
 0x281   : > { %v1311_v49 = vpop.xlane.xlu0 %1310  ;;  %v1743_v24 = vsel %vm1722_vm1, %v1595_v15, %v1586_v22 }
 0x282   : > { %v1599_v11 = vrot.slane %v1311_v49, %v3190_v34 }
 0x285   : > { %v1313_v50 = vpop.xlane.xlu1 %1312  ;;  %v3205_v51 = vpop.xlane.xlu0 %1238 }
 0x286   : > { %v1603_v5 = vrot.slane %v1313_v50, %v3192_v0 }
 0x288   : > { %v1604_v17 = vsel %vm1441_vm0, %v1603_v5, %v1599_v11 }
 0x289   : > { %v3207_v52 = vpop.xlane.xlu0 %1240  ;;  %v1744_v28 = vsel %vm1724_vm2, %v1604_v17, %v1743_v24 }
 0x28a   : > { %v3209_v53 = vpop.xlane.xlu1 %1242 }
 0x28d   : > { %v1315_v54 = vpop.xlane.xlu0 %1314 }
 0x28e   : > { %v1317_v55 = vpop.xlane.xlu1 %1316  ;;  %v1608_v9 = vrot.slane %v1315_v54, %v3190_v34  ;;  %v1440_v54 = vrot.slane %v3207_v52, %v3192_v0 }
 0x28f   : > { %v1612_v10 = vrot.slane %v1317_v55, %v3192_v0  ;;  %v1446_v55 = vrot.slane %v3209_v53, %v3190_v34 }
 0x291   : > { %v1319_v56 = vpop.xlane.xlu0 %1318  ;;  %v1613_v23 = vsel %vm1441_vm0, %v1612_v10, %v1608_v9 }
 0x292   : > { %v3211_v57 = vpop.xlane.xlu1 %1244  ;;  %v1617_v18 = vrot.slane %v1319_v56, %v3190_v34  ;;  %v1745_v31 = vsel %vm1726_vm3, %v1613_v23, %v1744_v28 }
 0x293   : > { %v1450_v47 = vrot.slane %v3211_v57, %v3192_v0 }
 0x295   : > { %v3213_v58 = vpop.xlane.xlu0 %1246 }
 0x296   : > { %v1321_v59 = vpop.xlane.xlu1 %1320 }
 0x297   : > { %v1621_v12 = vrot.slane %v1321_v59, %v3192_v0  ;;  %v1455_v59 = vrot.slane %v3213_v58, %v3190_v34 }
 0x299   : > { %v1323_v60 = vpop.xlane.xlu0 %1322  ;;  %v1622_v25 = vsel %vm1441_vm0, %v1621_v12, %v1617_v18 }
 0x29a   : > { %v3215_v61 = vpop.xlane.xlu1 %1248  ;;  %v1626_v19 = vrot.slane %v1323_v60, %v3190_v34  ;;  %v1746_v35 = vsel %vm1728_vm4, %v1622_v25, %v1745_v31  ;;  %v1435_v60 = vrot.slane %v3205_v51, %v3190_v34 }
 0x29b   : > { %v1459_v49 = vrot.slane %v3215_v61, %v3192_v0  ;;  %v1451_v61 = vsel %vm1441_vm0, %v1450_v47, %v1446_v55 }
 0x29c   : > { %v1442_v5 = vsel %vm1441_vm0, %v1440_v54, %v1435_v60 }
 0x29d   : > { %v3217_v62 = vpop.xlane.xlu0 %1250  ;;  %v1460_v53 = vsel %vm1441_vm0, %v1459_v49, %v1455_v59  ;;  %v1723_v7 = vsel %vm1722_vm1, %v1451_v61, %v1442_v5 }
 0x29e   : > { %v1325_v63 = vpop.xlane.xlu1 %1324  ;;  %v1725_v9 = vsel %vm1724_vm2, %v1460_v53, %v1723_v7 }
 0x29f   : > { %v1630_v14 = vrot.slane %v1325_v63, %v3192_v0  ;;  %v1464_v63 = vrot.slane %v3217_v62, %v3190_v34 }
 0x2a1   : > { %v1327_v1 = vpop.xlane.xlu0 %1326  ;;  %v1631_v29 = vsel %vm1441_vm0, %v1630_v14, %v1626_v19 }
 0x2a2   : > { %v3219_v2 = vpop.xlane.xlu1 %1252  ;;  %v1635_v27 = vrot.slane %v1327_v1, %v3190_v34  ;;  %v1747_v38 = vsel %vm1730_vm5, %v1631_v29, %v1746_v35 }
 0x2a3   : > { %v1468_v56 = vrot.slane %v3219_v2, %v3192_v0 }
 0x2a5   : > { %v3222_v4 = vpop.xlane.xlu0 %1254  ;;  %v1469_v51 = vsel %vm1441_vm0, %v1468_v56, %v1464_v63 }
 0x2a6   : > { %v1329_v6 = vpop.xlane.xlu1 %1328  ;;  %v1473_v2 = vrot.slane %v3222_v4, %v3190_v34  ;;  %v1727_v11 = vsel %vm1726_vm3, %v1469_v51, %v1725_v9 }
 0x2a7   : > { %v1639_v20 = vrot.slane %v1329_v6, %v3192_v0 }
 0x2a9   : > { %v1331_v16 = vpop.xlane.xlu0 %1330  ;;  %v1640_v32 = vsel %vm1441_vm0, %v1639_v20, %v1635_v27 }
 0x2aa   : > { %v1257_v21 = vpop.xlane.xlu1 %1256  ;;  %v1644_v36 = vrot.slane %v1331_v16, %v3190_v34  ;;  %v1748_v39 = vsel %vm1732_vm6, %v1640_v32, %v1747_v38 }
 0x2ab   : > { %v1477_v57 = vrot.slane %v1257_v21, %v3192_v0 }
 0x2ad   : > { %v1259_v30 = vpop.xlane.xlu0 %1258  ;;  %v1478_v62 = vsel %vm1441_vm0, %v1477_v57, %v1473_v2 }
 0x2ae   : > { %v1333_v33 = vpop.xlane.xlu1 %1332  ;;  %v1482_v6 = vrot.slane %v1259_v30, %v3190_v34  ;;  %v1729_v15 = vsel %vm1728_vm4, %v1478_v62, %v1727_v11 }
 0x2af   : > { %v1648_v37 = vrot.slane %v1333_v33, %v3192_v0 }
 0x2b1   : > { %v1649_v41 = vsel %vm1441_vm0, %v1648_v37, %v1644_v36  ;;  %v3253_v42 = vpop.xlane.xlu0 %1334 }
 0x2b2   : > { %v1749_v43 = vsel %vm1734_vm7, %v1649_v41, %v1748_v39  ;;  %v1261_v44 = vpop.xlane.xlu1 %1260 }
 0x2b3   : > { %1764 = vst.msk [vmem:[#allocation2 + $0x10] sm:$0xff] %vm1761_vm8, %v1749_v43  ;;  %v1486_v52 = vrot.slane %v1261_v44, %v3192_v0  ;;  %v1653_v43 = vrot.slane %v3253_v42, %v3190_v34 }
 0x2b5   : > { %v1263_v26 = vpop.xlane.xlu0 %1262  ;;  %v1487_v10 = vsel %vm1441_vm0, %v1486_v52, %v1482_v6 }
 0x2b6   : > { %v3257_v46 = vpop.xlane.xlu1 %1336  ;;  %v1491_v8 = vrot.slane %v1263_v26, %v3190_v34  ;;  %v1731_v17 = vsel %vm1730_vm5, %v1487_v10, %v1729_v15 }
 0x2b7   : > { %v1657_v39 = vrot.slane %v3257_v46, %v3192_v0 }
 0x2b9   : > { %v3261_v48 = vpop.xlane.xlu0 %1338  ;;  %v1658_v49 = vsel %vm1441_vm0, %v1657_v39, %v1653_v43 }
 0x2ba   : > { %v1265_v50 = vpop.xlane.xlu1 %1264 }
 0x2bb   : > { %v1495_v58 = vrot.slane %v1265_v50, %v3192_v0  ;;  %v1662_v50 = vrot.slane %v3261_v48, %v3190_v34 }
 0x2bd   : > { %v1267_v1 = vpop.xlane.xlu0 %1266  ;;  %v1496_v12 = vsel %vm1441_vm0, %v1495_v58, %v1491_v8 }
 0x2be   : > { %v1341_v3 = vpop.xlane.xlu1 %1340  ;;  %v1500_v14 = vrot.slane %v1267_v1, %v3190_v34  ;;  %v1733_v18 = vsel %vm1732_vm6, %v1496_v12, %v1731_v17 }
 0x2bf   : > { %v1666_v44 = vrot.slane %v1341_v3, %v3192_v0 }
 0x2c1   : > { %v1343_v4 = vpop.xlane.xlu0 %1342  ;;  %v1667_v57 = vsel %vm1441_vm0, %v1666_v44, %v1662_v50 }
 0x2c2   : > { %v1269_v13 = vpop.xlane.xlu1 %1268  ;;  %v1671_v60 = vrot.slane %v1343_v4, %v3190_v34 }
 0x2c3   : > { %v1504_v16 = vrot.slane %v1269_v13, %v3192_v0 }
 0x2c5   : > { %v1505_v20 = vsel %vm1441_vm0, %v1504_v16, %v1500_v14  ;;  %v1271_v21 = vpop.xlane.xlu0 %1270 }
 0x2c6   : > { %v1735_v22 = vsel %vm1734_vm7, %v1505_v20, %v1733_v18  ;;  %v1345_v23 = vpop.xlane.xlu1 %1344  ;;  %v1509_v61 = vrot.slane %v1271_v21, %v3190_v34  ;;  %v1750_v18 = vsel %vm1722_vm1, %v1667_v57, %v1658_v49 }
 0x2c7   : > { %1762 = vst.msk [vmem:[#allocation2] sm:$0xff] %vm1761_vm8, %v1735_v22  ;;  %v1675_v54 = vrot.slane %v1345_v23, %v3192_v0 }
 0x2c9   : > { %v1347_v19 = vpop.xlane.xlu0 %1346  ;;  %v1676_v3 = vsel %vm1441_vm0, %v1675_v54, %v1671_v60 }
 0x2ca   : > { %v1273_v24 = vpop.xlane.xlu1 %1272  ;;  %v1680_v1 = vrot.slane %v1347_v19, %v3190_v34  ;;  %v1751_v19 = vsel %vm1724_vm2, %v1676_v3, %v1750_v18 }
 0x2cb   : > { %v1513_v46 = vrot.slane %v1273_v24, %v3192_v0 }
 0x2cd   : > { %v1275_v25 = vpop.xlane.xlu0 %1274  ;;  %v1514_v7 = vsel %vm1441_vm0, %v1513_v46, %v1509_v61 }
 0x2ce   : > { %v1349_v27 = vpop.xlane.xlu1 %1348  ;;  %v1518_v56 = vrot.slane %v1275_v25, %v3190_v34  ;;  %v1766_v44 = vld [vmem:[#allocation2] sm:$0xff] }
 0x2cf   : > { %v1684_v42 = vrot.slane %v1349_v27, %v3192_v0 }
 0x2d1   : > { %v1351_v28 = vpop.xlane.xlu0 %1350  ;;  %v1685_v62 = vsel %vm1441_vm0, %v1684_v42, %v1680_v1 }
 0x2d2   : > { %v1277_v29 = vpop.xlane.xlu1 %1276  ;;  %v1689_v10 = vrot.slane %v1351_v28, %v3190_v34  ;;  %v1752_v28 = vsel %vm1726_vm3, %v1685_v62, %v1751_v19 }
 0x2d3   : > { %v1522_v47 = vrot.slane %v1277_v29, %v3192_v0 }
 0x2d5   : > { %v1279_v30 = vpop.xlane.xlu0 %1278  ;;  %v1523_v53 = vsel %vm1441_vm0, %v1522_v47, %v1518_v56 }
 0x2d6   : > { %v1353_v31 = vpop.xlane.xlu1 %1352  ;;  %v1527_v48 = vrot.slane %v1279_v30, %v3190_v34  ;;  %v1736_v4 = vsel %vm1722_vm1, %v1523_v53, %v1514_v7 }
 0x2d7   : > { %v1693_v5 = vrot.slane %v1353_v31, %v3192_v0 }
 0x2d9   : > { %v1355_v32 = vpop.xlane.xlu0 %1354  ;;  %v1694_v20 = vsel %vm1441_vm0, %v1693_v5, %v1689_v10 }
 0x2da   : > { %v1281_v33 = vpop.xlane.xlu1 %1280  ;;  %v1698_v15 = vrot.slane %v1355_v32, %v3190_v34  ;;  %v1753_v32 = vsel %vm1728_vm4, %v1694_v20, %v1752_v28 }
 0x2db   : > { %v1531_v55 = vrot.slane %v1281_v33, %v3192_v0 }
 0x2dd   : > { %v1283_v35 = vpop.xlane.xlu0 %1282  ;;  %v1532_v51 = vsel %vm1441_vm0, %v1531_v55, %v1527_v48 }
 0x2de   : > { %v1357_v36 = vpop.xlane.xlu1 %1356  ;;  %v1536_v2 = vrot.slane %v1283_v35, %v3190_v34  ;;  %v1737_v14 = vsel %vm1724_vm2, %v1532_v51, %v1736_v4 }
 0x2df   : > { %v1702_v8 = vrot.slane %v1357_v36, %v3192_v0 }
 0x2e1   : > { %v1359_v37 = vpop.xlane.xlu0 %1358  ;;  %v1703_v24 = vsel %vm1441_vm0, %v1702_v8, %v1698_v15 }
 0x2e2   : > { %v1285_v38 = vpop.xlane.xlu1 %1284  ;;  %v1707_v21 = vrot.slane %v1359_v37, %v3190_v34  ;;  %v1754_v37 = vsel %vm1730_vm5, %v1703_v24, %v1753_v32 }
 0x2e3   : > { %v1540_v59 = vrot.slane %v1285_v38, %v3192_v0 }
 0x2e5   : > { %v1287_v41 = vpop.xlane.xlu0 %1286  ;;  %v1541_v9 = vsel %vm1441_vm0, %v1540_v59, %v1536_v2 }
 0x2e6   : > { %v1361_v26 = vpop.xlane.xlu1 %1360  ;;  %v1545_v6 = vrot.slane %v1287_v41, %v3190_v34  ;;  %v1738_v22 = vsel %vm1726_vm3, %v1541_v9, %v1737_v14 }
 0x2e7   : > { %v1711_v11 = vrot.slane %v1361_v26, %v3192_v0 }
 0x2e9   : > { %v1291_v52 = vpop.xlane.xlu0 %1290  ;;  %v1712_v29 = vsel %vm1441_vm0, %v1711_v11, %v1707_v21 }
 0x2ea   : > { %v1289_v63 = vpop.xlane.xlu1 %1288  ;;  %v1554_v16 = vrot.slane %v1291_v52, %v3190_v34  ;;  %v1755_v39 = vsel %vm1732_vm6, %v1712_v29, %v1754_v37 }
 0x2eb   : > { %v1549_v58 = vrot.slane %v1289_v63, %v3192_v0 }
 0x2ed   : > { %v1550_v12 = vsel %vm1441_vm0, %v1549_v58, %v1545_v6  ;;  %v1363_v23 = vpop.xlane.xlu0 %1362 }
 0x2ee   : > { %v1293_v13 = vpop.xlane.xlu1 %1292  ;;  %v1739_v25 = vsel %vm1728_vm4, %v1550_v12, %v1738_v22  ;;  %v1716_v35 = vrot.slane %v1363_v23, %v3190_v34 }
 0x2ef   : > { %v1558_v17 = vrot.slane %v1293_v13, %v3192_v0 }
 0x2f1   : > { %v1559_v27 = vsel %vm1441_vm0, %v1558_v17, %v1554_v16 }
 0x2f2   : > { %v1740_v30 = vsel %vm1730_vm5, %v1559_v27, %v1739_v25  ;;  %v1365_v31 = vpop.xlane.xlu1 %1364 }
 0x2f3   : > { %v1741_v33 = vsel %vm1732_vm6, %v3198_v40, %v1740_v30  ;;  %v1720_v36 = vrot.slane %v1365_v31, %v3192_v0  ;;  %v1768_v40 = vld [vmem:[#allocation2 + $0x10] sm:$0xff] }
 0x2f4   : > { %v1742_v38 = vsel %vm1734_vm7, %v3203_v45, %v1741_v33  ;;  %v1772_v47 = vsel %vm1761_vm8, %v1768_v40, -inf  ;;  %v1770_v45 = vsel %vm1761_vm8, %v1766_v44, -inf }
 0x2f5   : > { %1763 = vst.msk [vmem:[#allocation2 + $0x8] sm:$0xff] %vm1761_vm8, %v1742_v38  ;;  %v1721_v41 = vsel %vm1441_vm0, %v1720_v36, %v1716_v35 }
 0x2f6   : > { %v1756_v43 = vsel %vm1734_vm7, %v1721_v41, %v1755_v39 }
 0x2f7   : > { %1765 = vst.msk [vmem:[#allocation2 + $0x18] sm:$0xff] %vm1761_vm8, %v1756_v43 }
 0x2fc   : > { %v1767_v34 = vld [vmem:[#allocation2 + $0x8] sm:$0xff] }
 0x2fd   : > { %v1771_v0 = vsel %vm1761_vm8, %v1767_v34, -inf }
 0x2fe   : > { %v1769_v26 = vld [vmem:[#allocation2 + $0x18] sm:$0xff]  ;;  %v1774_v50 = vmax.f32 %v1770_v45, %v1771_v0 }
 0x2ff   : > { %v1773_v49 = vsel %vm1761_vm8, %v1769_v26, -inf }
 0x300   : > { %v1775_v54 = vmax.f32 %v1772_v47, %v1773_v49 }
 0x302   : > { %v1776_v55 = vmax.f32 %v1774_v50, %v1775_v54 }
 0x304   : > { %v1777_v46 = vrot.slane %v1776_v55, 4 }
 0x306   : > { %v1778_v56 = vmax.f32 %v1776_v55, %v1777_v46 }
 0x308   : > { %v1779_v42 = vrot.slane %v1778_v56, 2 }
 0x30a   : > { %v1780_v59 = vmax.f32 %v1778_v56, %v1779_v42 }
 0x30c   : > { %v1781_v57 = vrot.slane %v1780_v59, 1 }
 0x30e   : > { %v1782_v60 = vmax.f32 %v1780_v59, %v1781_v57 }
 0x310   : > { %v1783_v61 = vsub.f32 %v1766_v44, %v1782_v60  ;;  %v1784_v48 = vsub.f32 %v1767_v34, %v1782_v60  ;;  %v1785_v63 = vsub.f32 %v1768_v40, %v1782_v60  ;;  %v1786_v52 = vsub.f32 %v1769_v26, %v1782_v60 }
 0x312   : > { %v1787_v1 = vmul.f32 1.442695, %v1783_v61  ;;  %v1789_v53 = vmul.f32 1.442695, %v1784_v48  ;;  %v1791_v2 = vmul.f32 1.442695, %v1785_v63 }
 0x313   : > { %v1793_v58 = vmul.f32 1.442695, %v1786_v52 }
 0x314   : > { %2369 = vpow2.f32 %v1787_v1 }
 0x315   : > { %2371 = vpow2.f32 %v1789_v53 }
 0x316   : > { %2373 = vpow2.f32 %v1791_v2 }
 0x317   : > { %2375 = vpow2.f32 %v1793_v58 }
 0x31e   : > { %v2370_v3 = vpop.eup %2369 }
 0x31f   : > { %v2372_v5 = vpop.eup %2371  ;;  %v1795_v51 = vsel %vm1761_vm8, %v2370_v3, 0.0 }
 0x320   : > { %v2374_v6 = vpop.eup %2373  ;;  %v1796_v7 = vsel %vm1761_vm8, %v2372_v5, 0.0 }
 0x321   : > { %v2376_v62 = vpop.eup %2375  ;;  %v1797_v8 = vadd.f32 %v1796_v7, %v1795_v51  ;;  %v1798_v9 = vsel %vm1761_vm8, %v2374_v6, 0.0 }
 0x322   : > { %v1800_v4 = vsel %vm1761_vm8, %v2376_v62, 0.0 }
 0x323   : > { %v1799_v10 = vadd.f32 %v1798_v9, %v1797_v8 }
 0x325   : > { %v1801_v11 = vadd.f32 %v1800_v4, %v1799_v10 }
 0x327   : > { %v1802_v12 = vrot.slane %v1801_v11, 4 }
 0x329   : > { %v1803_v13 = vadd.f32 %v1802_v12, %v1801_v11 }
 0x32b   : > { %v1804_v15 = vrot.slane %v1803_v13, 2 }
 0x32d   : > { %v1805_v14 = vadd.f32 %v1804_v15, %v1803_v13 }
 0x32f   : > { %v1806_v16 = vrot.slane %v1805_v14, 1 }
 0x331   : > { %v1807_v17 = vadd.f32 %v1806_v16, %v1805_v14 }
 0x333   : > { %2377 = vrcp.f32 %v1807_v17 }
 0x33d   : > { %v2378_v18 = vpop.eup %2377 }
 0x33e   : > { %v1809_v20 = vmul.f32 %v2378_v18, %v1807_v17 }
 0x340   : > { %v1810_v21 = vsub.f32 2.0, %v1809_v20 }
 0x342   : > { %v1811_v22 = vmul.f32 %v2378_v18, %v1810_v21 }
 0x344   : > { %v1812_v23 = vmul.f32 %v2370_v3, %v1811_v22  ;;  %v1813_v19 = vmul.f32 %v2372_v5, %v1811_v22  ;;  %v1814_v24 = vmul.f32 %v2374_v6, %v1811_v22  ;;  %v1815_v25 = vmul.f32 %v2376_v62, %v1811_v22 }
 0x346   : > { %1816 = vst.msk [vmem:[%s393_s20] sm:$0xff] %vm1761_vm8, %v1812_v23  ;;  %1817 = vst.msk [vmem:[%s393_s20 + $0x8] sm:$0xff] %vm1761_vm8, %v1813_v19 }
 0x347   : > { %1818 = vst.msk [vmem:[%s393_s20 + $0x10] sm:$0xff] %vm1761_vm8, %v1814_v24  ;;  %1819 = vst.msk [vmem:[%s393_s20 + $0x18] sm:$0xff] %vm1761_vm8, %v1815_v25 }
 0x348 PF: > { %s3421_s25 = sld [smem:[#allocation21_spill]]  ;;  %p21_p8 = scmp.ge.s32.totalorder %s2644_s26, 6  }
 0x349   : > { %s3422_s21 = smov %s2561_s22  ;;  %s3423_s22 = smov %s2565_s23 }
 0x34a   : > { %s3425_s24 = smov %s2644_s26  ;;  %23 = sbr.rel (!%p21_p8) target bundleno = 7 (0x7), region = 118 }
 0x34e   : > { %s3424_s23 = smov %s3421_s25 }
 0x351   :  { %1841 = vsyncpa [#allocation4], 1 }
 0x352   :  { %1843 = vsyncpa [#allocation4 + $0x1], 1 }
 0x353   :  { %1844 = vsyncpa [#allocation6], 1 }
 0x354   :  { %1846 = vsyncpa [#allocation6 + $0x1], 1 }
 0x355   :  { %1847 = vsyncpa [#allocation9], 1 }
 0x356   :  { %1848 = vsyncpa [#allocation12], 1 }

</bundles_post_ra>
